<compile_context>
chip_gen: v7x
topology: tpu7x:2x2x1
jax: 0.10.0
libtpu: 0.0.40
codegen_flags: <defaults>
</compile_context>

<pallas_src>
import jax
import jax.numpy as jnp
from jax.experimental import pallas as pl
from jax.experimental.pallas import tpu as pltpu


def _bottleneck_kernel(x_ref, s1_ref, t1_ref, w1_ref, b1_ref,
                       s2_ref, t2_ref, w3_ref, b3_ref, o_ref, y2pad_ref):
    # x_ref:      (H, W, Cin)          full image, resident per batch element
    # s1/t1:      (1, Cin)             folded BN1 scale / shift
    # w1:         (Cin, Cmid)          1x1 conv as a matmul (mxu dtype)
    # b1:         (1, Cmid)
    # s2/t2:      (1, Cmid)            folded BN2 scale / shift
    # w3:         (3, 3, Cmid, Cout)   3x3 conv taps (mxu dtype)
    # b3:         (1, Cout)
    # o_ref:      (TH, W, Cout)        new-feature rows for this tile
    # y2pad_ref:  (TH+2, W+2, Cmid)    zero-padded ReLU(BN2(conv1(...))) tile
    h = pl.program_id(1)
    n_h = pl.num_programs(1)
    H, W, Cin = x_ref.shape
    TH, _, Cout = o_ref.shape
    Cmid = w1_ref.shape[-1]
    r0 = pl.multiple_of(h * TH, TH)

    w1 = w1_ref[...]
    w3 = w3_ref[...]

    def stage1(xrows):
        # BN1(eval) + ReLU + 1x1 conv + BN2(eval) + ReLU
        # (R, W, Cin) -> (R, W, Cmid); elementwise math in f32, dot on the MXU.
        R = xrows.shape[0]
        y = jnp.maximum(xrows * s1_ref[...] + t1_ref[...], 0.0)
        z = jnp.dot(y.reshape(R * W, Cin).astype(w1.dtype), w1,
                    preferred_element_type=jnp.float32) + b1_ref[...]
        y2 = jnp.maximum(z * s2_ref[...] + t2_ref[...], 0.0)
        return y2.reshape(R, W, Cmid)

    # ---- build the zero-padded (TH+2, W+2, Cmid) intermediate tile ---------
    # W-border columns = conv2's zero padding in W.  Re-zeroed every step so
    # no scratch state is assumed across (possibly core-sharded) grid steps.
    y2pad_ref[:, 0:1, :] = jnp.zeros((TH + 2, 1, Cmid), jnp.float32)
    y2pad_ref[:, W + 1:W + 2, :] = jnp.zeros((TH + 2, 1, Cmid), jnp.float32)

    # Main TH rows of this tile.
    y2pad_ref[1:TH + 1, 1:W + 1, :] = stage1(x_ref[pl.ds(r0, TH)])

    # Top / bottom halo rows: branchless — compute on a clamped valid row and
    # mask to zero at the image border (== conv2's zero padding in H).
    top = stage1(x_ref[pl.ds(jnp.maximum(r0 - 1, 0), 1)])
    y2pad_ref[0:1, 1:W + 1, :] = jnp.where(h > 0, top, jnp.zeros_like(top))
    bot = stage1(x_ref[pl.ds(jnp.minimum(r0 + TH, H - 1), 1)])
    y2pad_ref[TH + 1:TH + 2, 1:W + 1, :] = jnp.where(h < n_h - 1, bot,
                                                     jnp.zeros_like(bot))

    # ---- 3x3 conv = 9 shifted matmuls on the MXU, f32 accumulation ---------
    acc = jnp.zeros((TH * W, Cout), jnp.float32)
    for dy in range(3):
        for dx in range(3):
            tap = y2pad_ref[dy:dy + TH, dx:dx + W, :]            # (TH, W, Cmid)
            acc = acc + jnp.dot(tap.reshape(TH * W, Cmid).astype(w3.dtype),
                                w3[dy, dx],
                                preferred_element_type=jnp.float32)
    out = acc + b3_ref[...]
    o_ref[...] = out.reshape(TH, W, Cout).astype(o_ref.dtype)


def bottleneck(x_nchw,
               gamma1, beta1, mean1, var1, conv1_w, conv1_b,
               gamma2, beta2, mean2, var2, conv2_w, conv2_b,
               *, eps=1e-5, block_h=8, mxu_dtype=jnp.float32):
    """DenseNet BottleNeck forward (eval-mode BN).

    x_nchw: (N, Cin, H, W) f32.  conv1_w: (Cmid, Cin, 1, 1),
    conv2_w: (Cout, Cmid, 3, 3).  Returns (N, Cin + Cout, H, W),
    i.e. torch.cat((x, conv2(relu(bn2(conv1(relu(bn1(x))))))), dim=1).
    """
    N, Cin, H, W = x_nchw.shape
    Cmid = conv1_w.shape[0]
    Cout = conv2_w.shape[0]
    if H % block_h != 0:
        block_h = H                      # fall back to a single row tile
    n_h = H // block_h

    # Fold BN running stats into per-channel scale/shift (plain-JAX glue).
    s1 = gamma1 / jnp.sqrt(var1 + eps)
    t1 = beta1 - mean1 * s1
    s2 = gamma2 / jnp.sqrt(var2 + eps)
    t2 = beta2 - mean2 * s2

    # Conv weights in matmul-friendly layouts; cast to mxu_dtype (bf16 on
    # v6e/v7x halves weight DMA + VMEM; f32 here for the strict check).
    w1 = conv1_w.reshape(Cmid, Cin).T.astype(mxu_dtype)              # (Cin, Cmid)
    w3 = jnp.transpose(conv2_w, (2, 3, 1, 0)).astype(mxu_dtype)      # (3,3,Cmid,Cout)

    # TODO(synk): keep the surrounding model NHWC to remove this transpose and
    # the one on the output (each is a full extra HBM read+write).
    x_nhwc = jnp.transpose(x_nchw, (0, 2, 3, 1))

    new_nhwc = pl.pallas_call(
        _bottleneck_kernel,
        out_shape=jax.ShapeDtypeStruct((N, H, W, Cout), x_nchw.dtype),
        grid_spec=pltpu.PrefetchScalarGridSpec(
            num_scalar_prefetch=0,
            grid=(N, n_h),
            in_specs=[
                # Whole image per batch element; the block index ignores the
                # inner h axis so it is DMA'd once per n and stays resident
                # while the row tiles (and their 3x3 halos) are read from it.
                pl.BlockSpec((None, H, W, Cin), lambda n, h: (n, 0, 0, 0)),
                # Constant block indices -> fetched once, no per-step re-DMA.
                pl.BlockSpec((1, Cin), lambda n, h: (0, 0)),
                pl.BlockSpec((1, Cin), lambda n, h: (0, 0)),
                pl.BlockSpec((Cin, Cmid), lambda n, h: (0, 0)),
                pl.BlockSpec((1, Cmid), lambda n, h: (0, 0)),
                pl.BlockSpec((1, Cmid), lambda n, h: (0, 0)),
                pl.BlockSpec((1, Cmid), lambda n, h: (0, 0)),
                pl.BlockSpec((3, 3, Cmid, Cout), lambda n, h: (0, 0, 0, 0)),
                pl.BlockSpec((1, Cout), lambda n, h: (0, 0)),
            ],
            out_specs=pl.BlockSpec((None, block_h, W, Cout),
                                   lambda n, h: (n, h, 0, 0)),
            scratch_shapes=[
                pltpu.VMEM((block_h + 2, W + 2, Cmid), jnp.float32),
            ],
        ),
        compiler_params=pltpu.CompilerParams(
            # Both axes are independent -> shardable across v7x's 2 TensorCores.
            dimension_semantics=("parallel", "parallel"),
            # Explicit scoped-VMEM budget (fits v7x's 64 MiB physical VMEM).
            vmem_limit_bytes=32 * 1024 * 1024,
        ),
    )(x_nhwc, s1.reshape(1, Cin), t1.reshape(1, Cin), w1,
      conv1_b.reshape(1, Cmid), s2.reshape(1, Cmid), t2.reshape(1, Cmid),
      w3, conv2_b.reshape(1, Cout))

    new_nchw = jnp.transpose(new_nhwc, (0, 3, 1, 2))
    # torch.cat((x, out), dim=1) — dense-block concat done in plain JAX.
    return jnp.concatenate([x_nchw, new_nchw], axis=1)


def _reference(x, g1, b1, m1, v1, w1, c1b, g2, b2, m2, v2, w2, c2b, eps=1e-5):
    # Pure-JAX reference matching PyTorch eval-mode forward.
    s1 = g1 / jnp.sqrt(v1 + eps)
    y = jnp.maximum((x - m1[None, :, None, None]) * s1[None, :, None, None]
                    + b1[None, :, None, None], 0.0)
    z = jax.lax.conv_general_dilated(
        y, w1, window_strides=(1, 1), padding='VALID',
        dimension_numbers=('NCHW', 'OIHW', 'NCHW')) + c1b[None, :, None, None]
    s2 = g2 / jnp.sqrt(v2 + eps)
    y2 = jnp.maximum((z - m2[None, :, None, None]) * s2[None, :, None, None]
                     + b2[None, :, None, None], 0.0)
    z2 = jax.lax.conv_general_dilated(
        y2, w2, window_strides=(1, 1), padding=((1, 1), (1, 1)),
        dimension_numbers=('NCHW', 'OIHW', 'NCHW')) + c2b[None, :, None, None]
    return jnp.concatenate([x, z2], axis=1)


if __name__ == "__main__":
    key = jax.random.PRNGKey(0)
    N, n_in, growth = 2, 4, 4
    H = W = 16
    Cmid, Cout = 4 * growth, growth

    keys = jax.random.split(key, 13)
    x = jax.random.normal(keys[0], (N, n_in, H, W), dtype=jnp.float32)

    # Deterministic synthetic parameters (shapes from the module's __init__).
    gamma1 = 1.0 + 0.1 * jax.random.normal(keys[1], (n_in,), jnp.float32)
    beta1 = 0.05 * jax.random.normal(keys[2], (n_in,), jnp.float32)
    mean1 = 0.1 * jax.random.normal(keys[3], (n_in,), jnp.float32)
    var1 = jnp.abs(1.0 + 0.1 * jax.random.normal(keys[4], (n_in,), jnp.float32))
    conv1_w = 0.2 * jax.random.normal(keys[5], (Cmid, n_in, 1, 1), jnp.float32)
    conv1_b = 0.05 * jax.random.normal(keys[6], (Cmid,), jnp.float32)
    gamma2 = 1.0 + 0.1 * jax.random.normal(keys[7], (Cmid,), jnp.float32)
    beta2 = 0.05 * jax.random.normal(keys[8], (Cmid,), jnp.float32)
    mean2 = 0.1 * jax.random.normal(keys[9], (Cmid,), jnp.float32)
    var2 = jnp.abs(1.0 + 0.1 * jax.random.normal(keys[10], (Cmid,), jnp.float32))
    conv2_w = 0.2 * jax.random.normal(keys[11], (Cout, Cmid, 3, 3), jnp.float32)
    conv2_b = 0.05 * jax.random.normal(keys[12], (Cout,), jnp.float32)

    out = bottleneck(x, gamma1, beta1, mean1, var1, conv1_w, conv1_b,
                     gamma2, beta2, mean2, var2, conv2_w, conv2_b,
                     block_h=8, mxu_dtype=jnp.float32)
    out = jax.block_until_ready(out)

    ref = _reference(x, gamma1, beta1, mean1, var1, conv1_w, conv1_b,
                     gamma2, beta2, mean2, var2, conv2_w, conv2_b)
    assert out.shape == (N, n_in + growth, H, W), out.shape
    err = float(jnp.max(jnp.abs(out - ref)))
    assert jnp.allclose(out, ref, atol=1e-4, rtol=1e-4), err

    print("KERNEL_OK")
</pallas_src>

<mosaic_0001>
module attributes {stable_mosaic.version = 11 : i64} {
  func.func @_bottleneck_kernel(%arg0: i32, %arg1: i32, %arg2: memref<1x16x16x4xf32, #tpu.memory_space<vmem>>, %arg3: memref<1x4xf32, #tpu.memory_space<vmem>>, %arg4: memref<1x4xf32, #tpu.memory_space<vmem>>, %arg5: memref<4x16xf32, #tpu.memory_space<vmem>>, %arg6: memref<1x16xf32, #tpu.memory_space<vmem>>, %arg7: memref<1x16xf32, #tpu.memory_space<vmem>>, %arg8: memref<1x16xf32, #tpu.memory_space<vmem>>, %arg9: memref<3x3x16x4xf32, #tpu.memory_space<vmem>>, %arg10: memref<1x4xf32, #tpu.memory_space<vmem>>, %arg11: memref<1x8x16x4xf32, #tpu.memory_space<vmem>>, %arg12: memref<10x18x16xf32, #tpu.memory_space<vmem>>) attributes {dimension_semantics = [#tpu.dimension_semantics<parallel>, #tpu.dimension_semantics<parallel>], iteration_bounds = array<i64: 2, 2>, scalar_prefetch = 0 : i64, scratch_operands = 1 : i64, tpu.core_type = #tpu.core_type<tc>, window_params = [{transform_indices = @transform_0, window_bounds = array<i64: 1, 16, 16, 4>}, {pipeline_mode = #tpu.pipeline_mode<synchronous>, transform_indices = @transform_1, window_bounds = array<i64: 1, 4>}, {pipeline_mode = #tpu.pipeline_mode<synchronous>, transform_indices = @transform_2, window_bounds = array<i64: 1, 4>}, {pipeline_mode = #tpu.pipeline_mode<synchronous>, transform_indices = @transform_3, window_bounds = array<i64: 4, 16>}, {pipeline_mode = #tpu.pipeline_mode<synchronous>, transform_indices = @transform_4, window_bounds = array<i64: 1, 16>}, {pipeline_mode = #tpu.pipeline_mode<synchronous>, transform_indices = @transform_5, window_bounds = array<i64: 1, 16>}, {pipeline_mode = #tpu.pipeline_mode<synchronous>, transform_indices = @transform_6, window_bounds = array<i64: 1, 16>}, {pipeline_mode = #tpu.pipeline_mode<synchronous>, transform_indices = @transform_7, window_bounds = array<i64: 3, 3, 16, 4>}, {pipeline_mode = #tpu.pipeline_mode<synchronous>, transform_indices = @transform_8, window_bounds = array<i64: 1, 4>}, {transform_indices = @transform_9, window_bounds = array<i64: 1, 8, 16, 4>}]} {
    %c8_i32 = arith.constant 8 : i32
    %0 = arith.muli %arg1, %c8_i32 : i32
    %1 = tpu.assume_multiple %0, 8 : i32
    %c0 = arith.constant 0 : index
    %c0_0 = arith.constant 0 : index
    %2 = vector.load %arg5[%c0, %c0_0] : memref<4x16xf32, #tpu.memory_space<vmem>>, vector<4x16xf32>
    %c0_1 = arith.constant 0 : index
    %c0_2 = arith.constant 0 : index
    %c0_3 = arith.constant 0 : index
    %c0_4 = arith.constant 0 : index
    %3 = vector.load %arg9[%c0_1, %c0_2, %c0_3, %c0_4] : memref<3x3x16x4xf32, #tpu.memory_space<vmem>>, vector<3x3x16x4xf32>
    %cst = arith.constant 0.000000e+00 : f32
    %4 = vector.broadcast %cst : f32 to vector<10x1x16xf32>
    %c0_5 = arith.constant 0 : index
    %c0_6 = arith.constant 0 : index
    %c0_7 = arith.constant 0 : index
    %5 = vector.load %arg12[%c0_5, %c0_6, %c0_7] : memref<10x18x16xf32, #tpu.memory_space<vmem>>, vector<10x1x16xf32>
    tpu.vector_store %arg12[%c0_5, %c0_6, %c0_7], %4 {strides = array<i32>} : memref<10x18x16xf32, #tpu.memory_space<vmem>>, vector<10x1x16xf32>,
    %cst_8 = arith.constant 0.000000e+00 : f32
    %6 = vector.broadcast %cst_8 : f32 to vector<10x1x16xf32>
    %c0_9 = arith.constant 0 : index
    %c17 = arith.constant 17 : index
    %c0_10 = arith.constant 0 : index
    %7 = vector.load %arg12[%c0_9, %c17, %c0_10] : memref<10x18x16xf32, #tpu.memory_space<vmem>>, vector<10x1x16xf32>
    tpu.vector_store %arg12[%c0_9, %c17, %c0_10], %6 {strides = array<i32>} : memref<10x18x16xf32, #tpu.memory_space<vmem>>, vector<10x1x16xf32>,
    %c0_11 = arith.constant 0 : index
    %8 = arith.index_cast %1 : i32 to index
    %c0_12 = arith.constant 0 : index
    %c0_13 = arith.constant 0 : index
    %9 = vector.load %arg2[%c0_11, %8, %c0_12, %c0_13] : memref<1x16x16x4xf32, #tpu.memory_space<vmem>>, vector<1x8x16x4xf32>
    %10 = vector.shape_cast %9 : vector<1x8x16x4xf32> to vector<8x16x4xf32>
    %c0_14 = arith.constant 0 : index
    %c0_15 = arith.constant 0 : index
    %11 = vector.load %arg3[%c0_14, %c0_15] : memref<1x4xf32, #tpu.memory_space<vmem>>, vector<1x4xf32>
    %12 = vector.shape_cast %11 : vector<1x4xf32> to vector<1x1x4xf32>
    %13 = vector.broadcast %12 : vector<1x1x4xf32> to vector<8x16x4xf32>
    %14 = arith.mulf %10, %13 : vector<8x16x4xf32>
    %c0_16 = arith.constant 0 : index
    %c0_17 = arith.constant 0 : index
    %15 = vector.load %arg4[%c0_16, %c0_17] : memref<1x4xf32, #tpu.memory_space<vmem>>, vector<1x4xf32>
    %16 = vector.shape_cast %15 : vector<1x4xf32> to vector<1x1x4xf32>
    %17 = vector.broadcast %16 : vector<1x1x4xf32> to vector<8x16x4xf32>
    %18 = arith.addf %14, %17 : vector<8x16x4xf32>
    %cst_18 = arith.constant 0.000000e+00 : f32
    %19 = vector.broadcast %cst_18 : f32 to vector<8x16x4xf32>
    %20 = arith.maximumf %18, %19 : vector<8x16x4xf32>
    %21 = vector.shape_cast %20 : vector<8x16x4xf32> to vector<128x4xf32>
    %cst_19 = arith.constant dense<0.000000e+00> : vector<128x16xf32>
    %22 = tpu.matmul %21, %2, %cst_19 {dimension_numbers = #tpu.dot_dimension_numbers<[1], [0], [0], [1], [0, 0, 1, 1], [], []>} : vector<128x4xf32>, vector<4x16xf32>, vector<128x16xf32> -> vector<128x16xf32>
    %c0_20 = arith.constant 0 : index
    %c0_21 = arith.constant 0 : index
    %23 = vector.load %arg6[%c0_20, %c0_21] : memref<1x16xf32, #tpu.memory_space<vmem>>, vector<1x16xf32>
    %24 = vector.broadcast %23 : vector<1x16xf32> to vector<128x16xf32>
    %25 = arith.addf %22, %24 : vector<128x16xf32>
    %c0_22 = arith.constant 0 : index
    %c0_23 = arith.constant 0 : index
    %26 = vector.load %arg7[%c0_22, %c0_23] : memref<1x16xf32, #tpu.memory_space<vmem>>, vector<1x16xf32>
    %27 = vector.broadcast %26 : vector<1x16xf32> to vector<128x16xf32>
    %28 = arith.mulf %25, %27 : vector<128x16xf32>
    %c0_24 = arith.constant 0 : index
    %c0_25 = arith.constant 0 : index
    %29 = vector.load %arg8[%c0_24, %c0_25] : memref<1x16xf32, #tpu.memory_space<vmem>>, vector<1x16xf32>
    %30 = vector.broadcast %29 : vector<1x16xf32> to vector<128x16xf32>
    %31 = arith.addf %28, %30 : vector<128x16xf32>
    %cst_26 = arith.constant 0.000000e+00 : f32
    %32 = vector.broadcast %cst_26 : f32 to vector<128x16xf32>
    %33 = arith.maximumf %31, %32 : vector<128x16xf32>
    %34 = vector.shape_cast %33 : vector<128x16xf32> to vector<8x16x16xf32>
    %c1 = arith.constant 1 : index
    %c1_27 = arith.constant 1 : index
    %c0_28 = arith.constant 0 : index
    %35 = vector.load %arg12[%c1, %c1_27, %c0_28] : memref<10x18x16xf32, #tpu.memory_space<vmem>>, vector<8x16x16xf32>
    tpu.vector_store %arg12[%c1, %c1_27, %c0_28], %34 {strides = array<i32>} : memref<10x18x16xf32, #tpu.memory_space<vmem>>, vector<8x16x16xf32>,
    %c1_i32 = arith.constant 1 : i32
    %36 = arith.subi %1, %c1_i32 : i32
    %c0_i32 = arith.constant 0 : i32
    %37 = arith.maxsi %36, %c0_i32 : i32
    %c0_29 = arith.constant 0 : index
    %38 = arith.index_cast %37 : i32 to index
    %c0_30 = arith.constant 0 : index
    %c0_31 = arith.constant 0 : index
    %39 = vector.load %arg2[%c0_29, %38, %c0_30, %c0_31] : memref<1x16x16x4xf32, #tpu.memory_space<vmem>>, vector<1x1x16x4xf32>
    %40 = vector.shape_cast %39 : vector<1x1x16x4xf32> to vector<1x16x4xf32>
    %c0_32 = arith.constant 0 : index
    %c0_33 = arith.constant 0 : index
    %41 = vector.load %arg3[%c0_32, %c0_33] : memref<1x4xf32, #tpu.memory_space<vmem>>, vector<1x4xf32>
    %42 = vector.shape_cast %41 : vector<1x4xf32> to vector<1x1x4xf32>
    %43 = vector.broadcast %42 : vector<1x1x4xf32> to vector<1x16x4xf32>
    %44 = arith.mulf %40, %43 : vector<1x16x4xf32>
    %c0_34 = arith.constant 0 : index
    %c0_35 = arith.constant 0 : index
    %45 = vector.load %arg4[%c0_34, %c0_35] : memref<1x4xf32, #tpu.memory_space<vmem>>, vector<1x4xf32>
    %46 = vector.shape_cast %45 : vector<1x4xf32> to vector<1x1x4xf32>
    %47 = vector.broadcast %46 : vector<1x1x4xf32> to vector<1x16x4xf32>
    %48 = arith.addf %44, %47 : vector<1x16x4xf32>
    %cst_36 = arith.constant 0.000000e+00 : f32
    %49 = vector.broadcast %cst_36 : f32 to vector<1x16x4xf32>
    %50 = arith.maximumf %48, %49 : vector<1x16x4xf32>
    %51 = vector.shape_cast %50 : vector<1x16x4xf32> to vector<16x4xf32>
    %cst_37 = arith.constant dense<0.000000e+00> : vector<16x16xf32>
    %52 = tpu.matmul %51, %2, %cst_37 {dimension_numbers = #tpu.dot_dimension_numbers<[1], [0], [0], [1], [0, 0, 1, 1], [], []>} : vector<16x4xf32>, vector<4x16xf32>, vector<16x16xf32> -> vector<16x16xf32>
    %c0_38 = arith.constant 0 : index
    %c0_39 = arith.constant 0 : index
    %53 = vector.load %arg6[%c0_38, %c0_39] : memref<1x16xf32, #tpu.memory_space<vmem>>, vector<1x16xf32>
    %54 = vector.broadcast %53 : vector<1x16xf32> to vector<16x16xf32>
    %55 = arith.addf %52, %54 : vector<16x16xf32>
    %c0_40 = arith.constant 0 : index
    %c0_41 = arith.constant 0 : index
    %56 = vector.load %arg7[%c0_40, %c0_41] : memref<1x16xf32, #tpu.memory_space<vmem>>, vector<1x16xf32>
    %57 = vector.broadcast %56 : vector<1x16xf32> to vector<16x16xf32>
    %58 = arith.mulf %55, %57 : vector<16x16xf32>
    %c0_42 = arith.constant 0 : index
    %c0_43 = arith.constant 0 : index
    %59 = vector.load %arg8[%c0_42, %c0_43] : memref<1x16xf32, #tpu.memory_space<vmem>>, vector<1x16xf32>
    %60 = vector.broadcast %59 : vector<1x16xf32> to vector<16x16xf32>
    %61 = arith.addf %58, %60 : vector<16x16xf32>
    %cst_44 = arith.constant 0.000000e+00 : f32
    %62 = vector.broadcast %cst_44 : f32 to vector<16x16xf32>
    %63 = arith.maximumf %61, %62 : vector<16x16xf32>
    %64 = vector.shape_cast %63 : vector<16x16xf32> to vector<1x16x16xf32>
    %c0_i32_45 = arith.constant 0 : i32
    %65 = arith.cmpi sgt, %arg1, %c0_i32_45 : i32
    %cst_46 = arith.constant 0.000000e+00 : f32
    %66 = vector.broadcast %cst_46 : f32 to vector<1x16x16xf32>
    %67 = arith.select %65, %64, %66 : vector<1x16x16xf32>
    %c0_47 = arith.constant 0 : index
    %c1_48 = arith.constant 1 : index
    %c0_49 = arith.constant 0 : index
    %68 = vector.load %arg12[%c0_47, %c1_48, %c0_49] : memref<10x18x16xf32, #tpu.memory_space<vmem>>, vector<1x16x16xf32>
    tpu.vector_store %arg12[%c0_47, %c1_48, %c0_49], %67 {strides = array<i32>} : memref<10x18x16xf32, #tpu.memory_space<vmem>>, vector<1x16x16xf32>,
    %c8_i32_50 = arith.constant 8 : i32
    %69 = arith.addi %1, %c8_i32_50 : i32
    %c15_i32 = arith.constant 15 : i32
    %70 = arith.minsi %69, %c15_i32 : i32
    %c0_51 = arith.constant 0 : index
    %71 = arith.index_cast %70 : i32 to index
    %c0_52 = arith.constant 0 : index
    %c0_53 = arith.constant 0 : index
    %72 = vector.load %arg2[%c0_51, %71, %c0_52, %c0_53] : memref<1x16x16x4xf32, #tpu.memory_space<vmem>>, vector<1x1x16x4xf32>
    %73 = vector.shape_cast %72 : vector<1x1x16x4xf32> to vector<1x16x4xf32>
    %c0_54 = arith.constant 0 : index
    %c0_55 = arith.constant 0 : index
    %74 = vector.load %arg3[%c0_54, %c0_55] : memref<1x4xf32, #tpu.memory_space<vmem>>, vector<1x4xf32>
    %75 = vector.shape_cast %74 : vector<1x4xf32> to vector<1x1x4xf32>
    %76 = vector.broadcast %75 : vector<1x1x4xf32> to vector<1x16x4xf32>
    %77 = arith.mulf %73, %76 : vector<1x16x4xf32>
    %c0_56 = arith.constant 0 : index
    %c0_57 = arith.constant 0 : index
    %78 = vector.load %arg4[%c0_56, %c0_57] : memref<1x4xf32, #tpu.memory_space<vmem>>, vector<1x4xf32>
    %79 = vector.shape_cast %78 : vector<1x4xf32> to vector<1x1x4xf32>
    %80 = vector.broadcast %79 : vector<1x1x4xf32> to vector<1x16x4xf32>
    %81 = arith.addf %77, %80 : vector<1x16x4xf32>
    %cst_58 = arith.constant 0.000000e+00 : f32
    %82 = vector.broadcast %cst_58 : f32 to vector<1x16x4xf32>
    %83 = arith.maximumf %81, %82 : vector<1x16x4xf32>
    %84 = vector.shape_cast %83 : vector<1x16x4xf32> to vector<16x4xf32>
    %cst_59 = arith.constant dense<0.000000e+00> : vector<16x16xf32>
    %85 = tpu.matmul %84, %2, %cst_59 {dimension_numbers = #tpu.dot_dimension_numbers<[1], [0], [0], [1], [0, 0, 1, 1], [], []>} : vector<16x4xf32>, vector<4x16xf32>, vector<16x16xf32> -> vector<16x16xf32>
    %c0_60 = arith.constant 0 : index
    %c0_61 = arith.constant 0 : index
    %86 = vector.load %arg6[%c0_60, %c0_61] : memref<1x16xf32, #tpu.memory_space<vmem>>, vector<1x16xf32>
    %87 = vector.broadcast %86 : vector<1x16xf32> to vector<16x16xf32>
    %88 = arith.addf %85, %87 : vector<16x16xf32>
    %c0_62 = arith.constant 0 : index
    %c0_63 = arith.constant 0 : index
    %89 = vector.load %arg7[%c0_62, %c0_63] : memref<1x16xf32, #tpu.memory_space<vmem>>, vector<1x16xf32>
    %90 = vector.broadcast %89 : vector<1x16xf32> to vector<16x16xf32>
    %91 = arith.mulf %88, %90 : vector<16x16xf32>
    %c0_64 = arith.constant 0 : index
    %c0_65 = arith.constant 0 : index
    %92 = vector.load %arg8[%c0_64, %c0_65] : memref<1x16xf32, #tpu.memory_space<vmem>>, vector<1x16xf32>
    %93 = vector.broadcast %92 : vector<1x16xf32> to vector<16x16xf32>
    %94 = arith.addf %91, %93 : vector<16x16xf32>
    %cst_66 = arith.constant 0.000000e+00 : f32
    %95 = vector.broadcast %cst_66 : f32 to vector<16x16xf32>
    %96 = arith.maximumf %94, %95 : vector<16x16xf32>
    %97 = vector.shape_cast %96 : vector<16x16xf32> to vector<1x16x16xf32>
    %c1_i32_67 = arith.constant 1 : i32
    %98 = arith.cmpi slt, %arg1, %c1_i32_67 : i32
    %cst_68 = arith.constant 0.000000e+00 : f32
    %99 = vector.broadcast %cst_68 : f32 to vector<1x16x16xf32>
    %100 = arith.select %98, %97, %99 : vector<1x16x16xf32>
    %c9 = arith.constant 9 : index
    %c1_69 = arith.constant 1 : index
    %c0_70 = arith.constant 0 : index
    %101 = vector.load %arg12[%c9, %c1_69, %c0_70] : memref<10x18x16xf32, #tpu.memory_space<vmem>>, vector<1x16x16xf32>
    tpu.vector_store %arg12[%c9, %c1_69, %c0_70], %100 {strides = array<i32>} : memref<10x18x16xf32, #tpu.memory_space<vmem>>, vector<1x16x16xf32>,
    %cst_71 = arith.constant 0.000000e+00 : f32
    %102 = vector.broadcast %cst_71 : f32 to vector<128x4xf32>
    %c0_72 = arith.constant 0 : index
    %c0_73 = arith.constant 0 : index
    %c0_74 = arith.constant 0 : index
    %103 = vector.load %arg12[%c0_72, %c0_73, %c0_74] : memref<10x18x16xf32, #tpu.memory_space<vmem>>, vector<8x16x16xf32>
    %104 = vector.shape_cast %103 : vector<8x16x16xf32> to vector<128x16xf32>
    %105 = vector.extract_strided_slice %3 {offsets = [0, 0, 0, 0], sizes = [1, 1, 16, 4], strides = [1, 1, 1, 1]} : vector<3x3x16x4xf32> to vector<1x1x16x4xf32>
    %106 = vector.shape_cast %105 : vector<1x1x16x4xf32> to vector<16x4xf32>
    %cst_75 = arith.constant dense<0.000000e+00> : vector<128x4xf32>
    %107 = tpu.matmul %104, %106, %cst_75 {dimension_numbers = #tpu.dot_dimension_numbers<[1], [0], [0], [1], [0, 0, 1, 1], [], []>} : vector<128x16xf32>, vector<16x4xf32>, vector<128x4xf32> -> vector<128x4xf32>
    %108 = arith.addf %102, %107 : vector<128x4xf32>
    %c0_76 = arith.constant 0 : index
    %c1_77 = arith.constant 1 : index
    %c0_78 = arith.constant 0 : index
    %109 = vector.load %arg12[%c0_76, %c1_77, %c0_78] : memref<10x18x16xf32, #tpu.memory_space<vmem>>, vector<8x16x16xf32>
    %110 = vector.shape_cast %109 : vector<8x16x16xf32> to vector<128x16xf32>
    %111 = vector.extract_strided_slice %3 {offsets = [0, 1, 0, 0], sizes = [1, 1, 16, 4], strides = [1, 1, 1, 1]} : vector<3x3x16x4xf32> to vector<1x1x16x4xf32>
    %112 = vector.shape_cast %111 : vector<1x1x16x4xf32> to vector<16x4xf32>
    %cst_79 = arith.constant dense<0.000000e+00> : vector<128x4xf32>
    %113 = tpu.matmul %110, %112, %cst_79 {dimension_numbers = #tpu.dot_dimension_numbers<[1], [0], [0], [1], [0, 0, 1, 1], [], []>} : vector<128x16xf32>, vector<16x4xf32>, vector<128x4xf32> -> vector<128x4xf32>
    %114 = arith.addf %108, %113 : vector<128x4xf32>
    %c0_80 = arith.constant 0 : index
    %c2 = arith.constant 2 : index
    %c0_81 = arith.constant 0 : index
    %115 = vector.load %arg12[%c0_80, %c2, %c0_81] : memref<10x18x16xf32, #tpu.memory_space<vmem>>, vector<8x16x16xf32>
    %116 = vector.shape_cast %115 : vector<8x16x16xf32> to vector<128x16xf32>
    %117 = vector.extract_strided_slice %3 {offsets = [0, 2, 0, 0], sizes = [1, 1, 16, 4], strides = [1, 1, 1, 1]} : vector<3x3x16x4xf32> to vector<1x1x16x4xf32>
    %118 = vector.shape_cast %117 : vector<1x1x16x4xf32> to vector<16x4xf32>
    %cst_82 = arith.constant dense<0.000000e+00> : vector<128x4xf32>
    %119 = tpu.matmul %116, %118, %cst_82 {dimension_numbers = #tpu.dot_dimension_numbers<[1], [0], [0], [1], [0, 0, 1, 1], [], []>} : vector<128x16xf32>, vector<16x4xf32>, vector<128x4xf32> -> vector<128x4xf32>
    %120 = arith.addf %114, %119 : vector<128x4xf32>
    %c1_83 = arith.constant 1 : index
    %c0_84 = arith.constant 0 : index
    %c0_85 = arith.constant 0 : index
    %121 = vector.load %arg12[%c1_83, %c0_84, %c0_85] : memref<10x18x16xf32, #tpu.memory_space<vmem>>, vector<8x16x16xf32>
    %122 = vector.shape_cast %121 : vector<8x16x16xf32> to vector<128x16xf32>
    %123 = vector.extract_strided_slice %3 {offsets = [1, 0, 0, 0], sizes = [1, 1, 16, 4], strides = [1, 1, 1, 1]} : vector<3x3x16x4xf32> to vector<1x1x16x4xf32>
    %124 = vector.shape_cast %123 : vector<1x1x16x4xf32> to vector<16x4xf32>
    %cst_86 = arith.constant dense<0.000000e+00> : vector<128x4xf32>
    %125 = tpu.matmul %122, %124, %cst_86 {dimension_numbers = #tpu.dot_dimension_numbers<[1], [0], [0], [1], [0, 0, 1, 1], [], []>} : vector<128x16xf32>, vector<16x4xf32>, vector<128x4xf32> -> vector<128x4xf32>
    %126 = arith.addf %120, %125 : vector<128x4xf32>
    %c1_87 = arith.constant 1 : index
    %c1_88 = arith.constant 1 : index
    %c0_89 = arith.constant 0 : index
    %127 = vector.load %arg12[%c1_87, %c1_88, %c0_89] : memref<10x18x16xf32, #tpu.memory_space<vmem>>, vector<8x16x16xf32>
    %128 = vector.shape_cast %127 : vector<8x16x16xf32> to vector<128x16xf32>
    %129 = vector.extract_strided_slice %3 {offsets = [1, 1, 0, 0], sizes = [1, 1, 16, 4], strides = [1, 1, 1, 1]} : vector<3x3x16x4xf32> to vector<1x1x16x4xf32>
    %130 = vector.shape_cast %129 : vector<1x1x16x4xf32> to vector<16x4xf32>
    %cst_90 = arith.constant dense<0.000000e+00> : vector<128x4xf32>
    %131 = tpu.matmul %128, %130, %cst_90 {dimension_numbers = #tpu.dot_dimension_numbers<[1], [0], [0], [1], [0, 0, 1, 1], [], []>} : vector<128x16xf32>, vector<16x4xf32>, vector<128x4xf32> -> vector<128x4xf32>
    %132 = arith.addf %126, %131 : vector<128x4xf32>
    %c1_91 = arith.constant 1 : index
    %c2_92 = arith.constant 2 : index
    %c0_93 = arith.constant 0 : index
    %133 = vector.load %arg12[%c1_91, %c2_92, %c0_93] : memref<10x18x16xf32, #tpu.memory_space<vmem>>, vector<8x16x16xf32>
    %134 = vector.shape_cast %133 : vector<8x16x16xf32> to vector<128x16xf32>
    %135 = vector.extract_strided_slice %3 {offsets = [1, 2, 0, 0], sizes = [1, 1, 16, 4], strides = [1, 1, 1, 1]} : vector<3x3x16x4xf32> to vector<1x1x16x4xf32>
    %136 = vector.shape_cast %135 : vector<1x1x16x4xf32> to vector<16x4xf32>
    %cst_94 = arith.constant dense<0.000000e+00> : vector<128x4xf32>
    %137 = tpu.matmul %134, %136, %cst_94 {dimension_numbers = #tpu.dot_dimension_numbers<[1], [0], [0], [1], [0, 0, 1, 1], [], []>} : vector<128x16xf32>, vector<16x4xf32>, vector<128x4xf32> -> vector<128x4xf32>
    %138 = arith.addf %132, %137 : vector<128x4xf32>
    %c2_95 = arith.constant 2 : index
    %c0_96 = arith.constant 0 : index
    %c0_97 = arith.constant 0 : index
    %139 = vector.load %arg12[%c2_95, %c0_96, %c0_97] : memref<10x18x16xf32, #tpu.memory_space<vmem>>, vector<8x16x16xf32>
    %140 = vector.shape_cast %139 : vector<8x16x16xf32> to vector<128x16xf32>
    %141 = vector.extract_strided_slice %3 {offsets = [2, 0, 0, 0], sizes = [1, 1, 16, 4], strides = [1, 1, 1, 1]} : vector<3x3x16x4xf32> to vector<1x1x16x4xf32>
    %142 = vector.shape_cast %141 : vector<1x1x16x4xf32> to vector<16x4xf32>
    %cst_98 = arith.constant dense<0.000000e+00> : vector<128x4xf32>
    %143 = tpu.matmul %140, %142, %cst_98 {dimension_numbers = #tpu.dot_dimension_numbers<[1], [0], [0], [1], [0, 0, 1, 1], [], []>} : vector<128x16xf32>, vector<16x4xf32>, vector<128x4xf32> -> vector<128x4xf32>
    %144 = arith.addf %138, %143 : vector<128x4xf32>
    %c2_99 = arith.constant 2 : index
    %c1_100 = arith.constant 1 : index
    %c0_101 = arith.constant 0 : index
    %145 = vector.load %arg12[%c2_99, %c1_100, %c0_101] : memref<10x18x16xf32, #tpu.memory_space<vmem>>, vector<8x16x16xf32>
    %146 = vector.shape_cast %145 : vector<8x16x16xf32> to vector<128x16xf32>
    %147 = vector.extract_strided_slice %3 {offsets = [2, 1, 0, 0], sizes = [1, 1, 16, 4], strides = [1, 1, 1, 1]} : vector<3x3x16x4xf32> to vector<1x1x16x4xf32>
    %148 = vector.shape_cast %147 : vector<1x1x16x4xf32> to vector<16x4xf32>
    %cst_102 = arith.constant dense<0.000000e+00> : vector<128x4xf32>
    %149 = tpu.matmul %146, %148, %cst_102 {dimension_numbers = #tpu.dot_dimension_numbers<[1], [0], [0], [1], [0, 0, 1, 1], [], []>} : vector<128x16xf32>, vector<16x4xf32>, vector<128x4xf32> -> vector<128x4xf32>
    %150 = arith.addf %144, %149 : vector<128x4xf32>
    %c2_103 = arith.constant 2 : index
    %c2_104 = arith.constant 2 : index
    %c0_105 = arith.constant 0 : index
    %151 = vector.load %arg12[%c2_103, %c2_104, %c0_105] : memref<10x18x16xf32, #tpu.memory_space<vmem>>, vector<8x16x16xf32>
    %152 = vector.shape_cast %151 : vector<8x16x16xf32> to vector<128x16xf32>
    %153 = vector.extract_strided_slice %3 {offsets = [2, 2, 0, 0], sizes = [1, 1, 16, 4], strides = [1, 1, 1, 1]} : vector<3x3x16x4xf32> to vector<1x1x16x4xf32>
    %154 = vector.shape_cast %153 : vector<1x1x16x4xf32> to vector<16x4xf32>
    %cst_106 = arith.constant dense<0.000000e+00> : vector<128x4xf32>
    %155 = tpu.matmul %152, %154, %cst_106 {dimension_numbers = #tpu.dot_dimension_numbers<[1], [0], [0], [1], [0, 0, 1, 1], [], []>} : vector<128x16xf32>, vector<16x4xf32>, vector<128x4xf32> -> vector<128x4xf32>
    %156 = arith.addf %150, %155 : vector<128x4xf32>
    %c0_107 = arith.constant 0 : index
    %c0_108 = arith.constant 0 : index
    %157 = vector.load %arg10[%c0_107, %c0_108] : memref<1x4xf32, #tpu.memory_space<vmem>>, vector<1x4xf32>
    %158 = vector.broadcast %157 : vector<1x4xf32> to vector<128x4xf32>
    %159 = arith.addf %156, %158 : vector<128x4xf32>
    %160 = vector.shape_cast %159 : vector<128x4xf32> to vector<8x16x4xf32>
    %c0_109 = arith.constant 0 : index
    %c0_110 = arith.constant 0 : index
    %c0_111 = arith.constant 0 : index
    %c0_112 = arith.constant 0 : index
    %161 = vector.load %arg11[%c0_109, %c0_110, %c0_111, %c0_112] : memref<1x8x16x4xf32, #tpu.memory_space<vmem>>, vector<1x8x16x4xf32>
    %162 = vector.shape_cast %161 : vector<1x8x16x4xf32> to vector<8x16x4xf32>
    %163 = vector.shape_cast %160 : vector<8x16x4xf32> to vector<1x8x16x4xf32>
    tpu.vector_store %arg11[%c0_109, %c0_110, %c0_111, %c0_112], %163 {strides = array<i32>} : memref<1x8x16x4xf32, #tpu.memory_space<vmem>>, vector<1x8x16x4xf32>,
    return
  }
  func.func @transform_0(%arg0: i32, %arg1: i32) -> (i32, i32, i32, i32) {
    %c0_i32 = arith.constant 0 : i32
    %c0_i32_0 = arith.constant 0 : i32
    %c0_i32_1 = arith.constant 0 : i32
    %c0_i32_2 = arith.constant 0 : i32
    return %arg0, %c0_i32, %c0_i32_0, %c0_i32_1 : i32, i32, i32, i32
  }
  func.func @transform_1(%arg0: i32, %arg1: i32) -> (i32, i32) {
    %c0_i32 = arith.constant 0 : i32
    %c0_i32_0 = arith.constant 0 : i32
    %c0_i32_1 = arith.constant 0 : i32
    return %c0_i32, %c0_i32_0 : i32, i32
  }
  func.func @transform_2(%arg0: i32, %arg1: i32) -> (i32, i32) {
    %c0_i32 = arith.constant 0 : i32
    %c0_i32_0 = arith.constant 0 : i32
    %c0_i32_1 = arith.constant 0 : i32
    return %c0_i32, %c0_i32_0 : i32, i32
  }
  func.func @transform_3(%arg0: i32, %arg1: i32) -> (i32, i32) {
    %c0_i32 = arith.constant 0 : i32
    %c0_i32_0 = arith.constant 0 : i32
    %c0_i32_1 = arith.constant 0 : i32
    return %c0_i32, %c0_i32_0 : i32, i32
  }
  func.func @transform_4(%arg0: i32, %arg1: i32) -> (i32, i32) {
    %c0_i32 = arith.constant 0 : i32
    %c0_i32_0 = arith.constant 0 : i32
    %c0_i32_1 = arith.constant 0 : i32
    return %c0_i32, %c0_i32_0 : i32, i32
  }
  func.func @transform_5(%arg0: i32, %arg1: i32) -> (i32, i32) {
    %c0_i32 = arith.constant 0 : i32
    %c0_i32_0 = arith.constant 0 : i32
    %c0_i32_1 = arith.constant 0 : i32
    return %c0_i32, %c0_i32_0 : i32, i32
  }
  func.func @transform_6(%arg0: i32, %arg1: i32) -> (i32, i32) {
    %c0_i32 = arith.constant 0 : i32
    %c0_i32_0 = arith.constant 0 : i32
    %c0_i32_1 = arith.constant 0 : i32
    return %c0_i32, %c0_i32_0 : i32, i32
  }
  func.func @transform_7(%arg0: i32, %arg1: i32) -> (i32, i32, i32, i32) {
    %c0_i32 = arith.constant 0 : i32
    %c0_i32_0 = arith.constant 0 : i32
    %c0_i32_1 = arith.constant 0 : i32
    %c0_i32_2 = arith.constant 0 : i32
    %c0_i32_3 = arith.constant 0 : i32
    return %c0_i32, %c0_i32_0, %c0_i32_1, %c0_i32_2 : i32, i32, i32, i32
  }
  func.func @transform_8(%arg0: i32, %arg1: i32) -> (i32, i32) {
    %c0_i32 = arith.constant 0 : i32
    %c0_i32_0 = arith.constant 0 : i32
    %c0_i32_1 = arith.constant 0 : i32
    return %c0_i32, %c0_i32_0 : i32, i32
  }
  func.func @transform_9(%arg0: i32, %arg1: i32) -> (i32, i32, i32, i32) {
    %c0_i32 = arith.constant 0 : i32
    %c0_i32_0 = arith.constant 0 : i32
    %c0_i32_1 = arith.constant 0 : i32
    return %arg0, %arg1, %c0_i32, %c0_i32_0 : i32, i32, i32, i32
  }
}

</mosaic_0001>

<bundles_post_ra>
// kernel: tpu_custom_call.1
= control target key start
LH: loop header
LB: loop body
LE: loop exit
PB: predicated region body
PF: predicated region fallthrough
CT: control target
= control target key end

     0   :  { %s4152_s30 = smov 0   ;;  %s4154_s10 = smov 0   ;;  %s4969_s0 = inlined_call_operand.vmem [shape: f32[2,16,16,4], index: 0, kind: input, shape index: {}]   ;;  %s4970_s1 = inlined_call_operand.vmem [shape: f32[1,4], index: 1, kind: input, shape index: {}]   ;;  %s4971_s2 = inlined_call_operand.vmem [shape: f32[1,4], index: 2, kind: input, shape index: {}]   ;;  %s4972_s3 = inlined_call_operand.vmem [shape: f32[4,16], index: 3, kind: input, shape index: {}]   ;;  %s4973_s4 = inlined_call_operand.vmem [shape: f32[1,16], index: 4, kind: input, shape index: {}]   ;;  %s4974_s5 = inlined_call_operand.vmem [shape: f32[1,16], index: 5, kind: input, shape index: {}]   ;;  %s4975_s6 = inlined_call_operand.vmem [shape: f32[1,16], index: 6, kind: input, shape index: {}]   ;;  %s4976_s7 = inlined_call_operand.vmem [shape: f32[3,3,16,4], index: 7, kind: input, shape index: {}]   ;;  %s4977_s8 = inlined_call_operand.vmem [shape: f32[1,4], index: 8, kind: input, shape index: {}]   ;;  %s4978_s9 = inlined_call_operand.vmem [shape: f32[2,16,16,4], index: 9, kind: output, shape index: {}]  }
   0x1   :  { %s4156_s11 = smov 0   ;;  %s4158_s12 = smov 0  }
   0x2   :  { %s4160_s13 = smov 0  }
   0x3 LB: > { %s28_s14 = sadd.s32 1, %s4091_s11  ;;  %s31_s15 = sadd.s32 1, %s4095_s12  ;;  %s4099_s13 = sphi %s4160_s13, %s19_s13   ;;  %s4095_s12 = sphi %s4158_s12, %s4986_s12   ;;  %s4091_s11 = sphi %s4156_s11, %s4985_s11   ;;  %s4087_s10 = sphi %s4154_s10, %s4984_s10   ;;  %s4083_s30 = sphi %s4152_s30, %s4983_s30  }
   0x4   : > { %p29_p0 = scmp.ge.s32.totalorder %s28_s14, 2  ;;  %p3184_p1 = scmp.ge.s32.totalorder %s4099_s13, 1 }
   0x5   : > { %p301_p2 = scmp.lt.s32.totalorder %s4099_s13, 5 }
   0x6   : > { %s4988_s14 = smov (%p29_p0, %s28_s14), 0  ;;  %s4990_s15 = smov (!%p29_p0, %s31_s15), %s4095_s12 }
   0x7   : > { %p302_p3 = pnand %p3184_p1, %p301_p2  ;;  %p33_p4 = scmp.ge.s32.totalorder %s4990_s15, 2 }
   0x8   : > { %v359_v0 = vld [vmem:[%s4972_s3] sm:$0xf] (!%p302_p3)  ;;  %vm535_vm0 = vcmask (!%p302_p3), 1043456   ;;  %p342_p5 = scmp.lt.s32.totalorder (!%p302_p3), %s4087_s10, 1  ;;  %s4189_s18 = sshll.u32 (!%p302_p3), %s4083_s30, 3  ;;  %vm486_vm1 = vcmask (!%p302_p3), 31744  }
   0x9   : > { %s4992_s15 = smov (%p33_p4, %s4990_s15), 0  ;;  %305 = sbr.rel (%p302_p3) target bundleno = 633 (0x279), region = 56 }
   0xa   : > { %3568 = vmatprep.subr.msk.mxu0 (!%p302_p3), %vm535_vm0, %v359_v0  ;;  %3599 = vmatprep.subr.msk.mxu1 (!%p302_p3), %vm535_vm0, %v359_v0  ;;  %s3382_s19 = sshll.u32 (!%p302_p3), %s4083_s30, 7  ;;  %p350_p6 = scmp.lt.s32.totalorder (!%p302_p3), %s4189_s18, 15  ;;  %v4208_v1 = vld [vmem:[%s4970_s1] ss:$0 sm:$0xff] (!%p302_p3)  ;;  %vm378_vm2 = vcmask (!%p302_p3), 122880   ;;  %vm747_vm3 = vcmask (!%p302_p3), 130048  }
   0xb   : > { %3569 = vmatpush3.msk.msra.mxu0 (!%p302_p3), %vm535_vm0, %v359_v0  ;;  %3600 = vmatpush3.msk.msra.mxu1 (!%p302_p3), %vm535_vm0, %v359_v0  ;;  %v4217_v2 = vld [vmem:[%s4971_s2] ss:$0 sm:$0xff] (!%p302_p3)  ;;  %s907_s16 = sadd.s32 (!%p302_p3), 8, %s4189_s18  ;;  %s3215_s21 = sadd.s32 (!%p302_p3), 4294967295, %s4189_s18 }
   0xc   : > { %3594 = vmatprep.subr.msk.mxu0 (!%p302_p3), %vm535_vm0, %v359_v0  ;;  %p4235_p7 = scmp.lt.s32.totalorder (!%p302_p3), %s907_s16, 15  ;;  %p4259_p8 = scmp.gt.s32.totalorder (!%p302_p3), %s3215_s21, 0 }
   0xd   : > { %p1042_p9 = scmp.lt.s32.totalorder (!%p302_p3), %s4083_s30, 1  ;;  %p899_p10 = scmp.gt.s32.totalorder (!%p302_p3), %s4083_s30, 0 }
  0x10   : > { %s4994_s10 = smov (!%p342_p5, %s4087_s10), 1  ;;  %s4996_s16 = smov (!%p4235_p7, %s907_s16), 15 }
  0x11   : > { %s3381_s20 = sshll.u32 %s4994_s10, 8  ;;  %s3189_s26 = sshll.u32 %s4994_s10, 5 }
  0x12   : > { %s4203_s23 = scalar_lea.vmem %s4969_s0, %s3381_s20  ;;  %s3225_s24 = sshll.u32 %s4996_s16, 4 }
  0x13   : > { %s4212_s27 = scalar_lea.vmem %s4203_s23, %s3382_s19  ;;  %s4998_s21 = smov (!%p4259_p8, %s3215_s21), 0 }
  0x14   : > { %v401_v3 = vld [vmem:[%s4212_s27] sm:$0xff]  ;;  %v402_v4 = vld [vmem:[%s4212_s27 + $0x8] sm:$0xff]  ;;  %v403_v5 = vld [vmem:[%s4212_s27 + $0x10] sm:$0xff]  ;;  %s351_s10 = scalar_select %p350_p6, %s4189_s18, 15 }
  0x15   : > { %v424_v6 = vmul.f32 %v4208_v1, %v401_v3  ;;  %v425_v7 = vmul.f32 %v4208_v1, %v402_v4  ;;  %v426_v8 = vmul.f32 %v4208_v1, %v403_v5  ;;  %v404_v9 = vld [vmem:[%s4212_s27 + $0x18] sm:$0xff]  ;;  %v405_v10 = vld [vmem:[%s4212_s27 + $0x20] sm:$0xff]  ;;  %v406_v11 = vld [vmem:[%s4212_s27 + $0x28] sm:$0xff]  ;;  %s911_s18 = scalar_lea.vmem %s4203_s23, %s3225_s24  ;;  %s3216_s25 = sshll.u32 %s4998_s21, 4 }
  0x16   : > { %v427_v12 = vmul.f32 %v4208_v1, %v404_v9  ;;  %v428_v13 = vmul.f32 %v4208_v1, %v405_v10  ;;  %v407_v14 = vld [vmem:[%s4212_s27 + $0x30] sm:$0xff]  ;;  %s3188_s17 = sshll.u32 %s351_s10, 1  ;;  %v429_v19 = vmul.f32 %v4208_v1, %v406_v11  ;;  %v408_v25 = vld [vmem:[%s4212_s27 + $0x38] sm:$0xff]  ;;  %v409_v26 = vld [vmem:[%s4212_s27 + $0x40] sm:$0xff] }
  0x17   : > { %v447_v15 = vadd.f32 %v4217_v2, %v424_v6  ;;  %v448_v16 = vadd.f32 %v4217_v2, %v425_v7  ;;  %v449_v17 = vadd.f32 %v4217_v2, %v426_v8  ;;  %s4242_s20 = sadd.s32 %s3189_s26, %s3188_s17  ;;  %v430_v20 = vmul.f32 %v4208_v1, %v407_v14  ;;  %v410_v33 = vld [vmem:[%s4212_s27 + $0x48] sm:$0xff]  ;;  %v411_v34 = vld [vmem:[%s4212_s27 + $0x50] sm:$0xff]  ;;  %v912_v35 = vld [vmem:[%s911_s18] sm:$0xff]  ;;  %s768_s26 = scalar_lea.vmem %s4203_s23, %s3216_s25 }
  0x18   : > { %v450_v18 = vadd.f32 %v4217_v2, %v427_v12  ;;  %v451_v24 = vadd.f32 %v4217_v2, %v428_v13  ;;  %v452_v28 = vadd.f32 %v4217_v2, %v429_v19  ;;  %v431_v29 = vmul.f32 %v4208_v1, %v408_v25  ;;  %v913_v36 = vld [vmem:[%s911_s18 + $0x8] sm:$0xff]  ;;  %v412_v43 = vld [vmem:[%s4212_s27 + $0x58] sm:$0xff]  ;;  %v413_v45 = vld [vmem:[%s4212_s27 + $0x60] sm:$0xff]  ;;  %s4402_s21 = scalar_select %p1042_p9, 1, 0 }
  0x19   : > { %v463_v21 = vmax.f32 %v447_v15, 0.0  ;;  %v464_v22 = vmax.f32 %v448_v16, 0.0  ;;  %v465_v23 = vmax.f32 %v449_v17, 0.0  ;;  %v453_v31 = vadd.f32 %v4217_v2, %v430_v20  ;;  %v414_v55 = vld [vmem:[%s4212_s27 + $0x68] sm:$0xff]  ;;  %v415_v57 = vld [vmem:[%s4212_s27 + $0x70] sm:$0xff]  ;;  %v416_v3 = vld [vmem:[%s4212_s27 + $0x78] sm:$0xff] }
  0x1a   : > { %v466_v27 = vmax.f32 %v450_v18, 0.0  ;;  %v467_v30 = vmax.f32 %v451_v24, 0.0  ;;  %v432_v32 = vmul.f32 %v4208_v1, %v409_v26  ;;  %v468_v37 = vmax.f32 %v452_v28, 0.0  ;;  %v769_v4 = vld [vmem:[%s768_s26] sm:$0xff]  ;;  %v770_v10 = vld [vmem:[%s768_s26 + $0x8] sm:$0xff]  ;;  %v371_v24 = vld [vmem:[%s4976_s7 + $0x58] sm:$0xff] }
  0x1b   : > { %3570 = vmatprep.mubr.msk.f32.mxu0 %vm486_vm1, %v463_v21  ;;  %v454_v38 = vadd.f32 %v4217_v2, %v431_v29  ;;  %v433_v39 = vmul.f32 %v4208_v1, %v410_v33  ;;  %v469_v40 = vmax.f32 %v453_v31, 0.0  ;;  %v434_v42 = vmul.f32 %v4208_v1, %v411_v34  ;;  %v369_v21 = vld [vmem:[%s4976_s7 + $0x48] sm:$0xff]  ;;  %v362_v26 = vld [vmem:[%s4976_s7 + $0x10] sm:$0xff]  ;;  %v360_v29 = vld [vmem:[%s4976_s7] sm:$0xff]  ;;  %s900_s26 = scalar_select %p899_p10, 1, 0 }
  0x1c   : > { %3571 = vmatmul.mubr.msk.f32.vlgmr.msra.gmra.mrb[0].mxu0 %vm486_vm1, %v464_v22  ;;  %v455_v41 = vadd.f32 %v4217_v2, %v432_v32  ;;  %v921_v44 = vmul.f32 %v4208_v1, %v912_v35  ;;  %v922_v46 = vmul.f32 %v4208_v1, %v913_v36  ;;  %v435_v50 = vmul.f32 %v4208_v1, %v412_v43  ;;  %v4372_v32 = vld [vmem:[%s4973_s4] ss:$0 sm:$0xff]  ;;  %s3190_s23 = sshll.u32 %s4242_s20, 3 }
  0x1d   : > { %3595 = vmatpush3.msk.msra.mxu0 %vm535_vm0, %v359_v0  ;;  %3573 = vmatprep.mubr.msk.f32.mxu0 %vm486_vm1, %v465_v23  ;;  %v470_v48 = vmax.f32 %v454_v38, 0.0  ;;  %v456_v49 = vadd.f32 %v4217_v2, %v433_v39  ;;  %v457_v53 = vadd.f32 %v4217_v2, %v434_v42  ;;  %v436_v54 = vmul.f32 %v4208_v1, %v413_v45  ;;  %v370_v23 = vld [vmem:[%s4976_s7 + $0x50] sm:$0xff]  ;;  %v4377_v34 = vld [vmem:[%s4974_s5] ss:$0 sm:$0xff]  ;;  %s4904_s10 = scalar_lea.vmem %s4978_s9, %s3190_s23 }
  0x1e   : > { %v930_v47 = vadd.f32 %v4217_v2, %v921_v44  ;;  %v931_v51 = vadd.f32 %v4217_v2, %v922_v46  ;;  %v471_v52 = vmax.f32 %v455_v41, 0.0  ;;  %v458_v60 = vadd.f32 %v4217_v2, %v435_v50 }
  0x1f   : > { %v472_v59 = vmax.f32 %v456_v49, 0.0  ;;  %v437_v61 = vmul.f32 %v4208_v1, %v414_v55  ;;  %v473_v62 = vmax.f32 %v457_v53, 0.0  ;;  %v459_v63 = vadd.f32 %v4217_v2, %v436_v54 }
  0x20   : > { %3574 = vmatmul.mubr.msk.f32.gmra.mrb[2].mxu0 %vm486_vm1, %v466_v27  ;;  %v932_v56 = vmax.f32 %v930_v47, 0.0  ;;  %v933_v58 = vmax.f32 %v931_v51, 0.0  ;;  %v438_v0 = vmul.f32 %v4208_v1, %v415_v57  ;;  %v474_v5 = vmax.f32 %v458_v60, 0.0  ;;  %v363_v27 = vld [vmem:[%s4976_s7 + $0x18] sm:$0xff] }
  0x21   : > { %3576 = vmatprep.mubr.msk.f32.mxu0 %vm486_vm1, %v467_v30  ;;  %v460_v6 = vadd.f32 %v4217_v2, %v437_v61  ;;  %v439_v7 = vmul.f32 %v4208_v1, %v416_v3  ;;  %v475_v8 = vmax.f32 %v459_v63, 0.0  ;;  %v778_v11 = vmul.f32 %v4208_v1, %v769_v4  ;;  %v361_v30 = vld [vmem:[%s4976_s7 + $0x8] sm:$0xff] }
  0x22   : > { %3601 = vmatprep.mubr.msk.f32.mxu1 %vm486_vm1, %v932_v56  ;;  %v461_v9 = vadd.f32 %v4217_v2, %v438_v0  ;;  %v779_v14 = vmul.f32 %v4208_v1, %v770_v10  ;;  %v4101_v1 = vmov 0.0   ;;  %v4351_v25 = vpack.c.bf16 %v371_v24, %v370_v23 }
  0x23   : > { %3602 = vmatmul.mubr.msk.f32.vlgmr.msra.gmra.mrb[0].mxu1 %vm486_vm1, %v933_v58  ;;  %v476_v12 = vmax.f32 %v460_v6, 0.0  ;;  %v462_v13 = vadd.f32 %v4217_v2, %v439_v7  ;;  %v787_v16 = vadd.f32 %v4217_v2, %v778_v11  ;;  %390 = vst.msk [vmem:[#allocation2 + $0x29] sm:$0x1] %vm378_vm2, %v4101_v1  ;;  %379 = vst.msk [vmem:[#allocation2] sm:$0x1] %vm378_vm2, %v4101_v1 }
  0x24   : > { %3577 = vmatmul.mubr.msk.f32.gmra.mrb[4].mxu0 %vm486_vm1, %v468_v37  ;;  %v477_v15 = vmax.f32 %v461_v9, 0.0  ;;  %v788_v18 = vadd.f32 %v4217_v2, %v779_v14  ;;  %380 = vst.msk [vmem:[#allocation2 + $0x18] sm:$0x1] %vm378_vm2, %v4101_v1  ;;  %381 = vst.msk [vmem:[#allocation2 + $0x30] sm:$0x1] %vm378_vm2, %v4101_v1  ;;  %v368_v2 = vld [vmem:[%s4976_s7 + $0x40] sm:$0xff]  ;;  %v3856_v28 = vpack.c.bf16 %v363_v27, %v362_v26  ;;  %v1044_v14 = vstv %s4402_s21 }
  0x25   : > { %3579 = vmatprep.mubr.msk.f32.mxu0 %vm486_vm1, %v469_v40  ;;  %v478_v17 = vmax.f32 %v462_v13, 0.0  ;;  %v789_v19 = vmax.f32 %v787_v16, 0.0  ;;  %382 = vst.msk [vmem:[#allocation2 + $0x48] sm:$0x1] %vm378_vm2, %v4101_v1  ;;  %383 = vst.msk [vmem:[#allocation2 + $0x60] sm:$0x1] %vm378_vm2, %v4101_v1  ;;  %v3872_v22 = vpack.c.bf16 %v369_v21, %v368_v2  ;;  %v4366_v31 = vpack.c.bf16 %v361_v30, %v360_v29 }
  0x26   : > { %v790_v20 = vmax.f32 %v788_v18, 0.0  ;;  %384 = vst.msk [vmem:[#allocation2 + $0x78] sm:$0x1] %vm378_vm2, %v4101_v1  ;;  %385 = vst.msk [vmem:[#allocation2 + $0x90] sm:$0x1] %vm378_vm2, %v4101_v1  ;;  %3857 = vmatprep.subr.bf16.mxu0 %v3856_v28  ;;  %v373_v9 = vld [vmem:[%s4976_s7 + $0x68] sm:$0xff] }
  0x27   : > { %386 = vst.msk [vmem:[#allocation2 + $0xa8] sm:$0x1] %vm378_vm2, %v4101_v1  ;;  %387 = vst.msk [vmem:[#allocation2 + $0xc0] sm:$0x1] %vm378_vm2, %v4101_v1  ;;  %3873 = vmatprep.subr.bf16.mxu1 %v3872_v22  ;;  %v4383_v37 = vld [vmem:[%s4975_s6] ss:$0 sm:$0xff] }
  0x28   : > { %3580 = vmatmul.mubr.msk.f32.gmra.mrb[6].mxu0 %vm486_vm1, %v470_v48  ;;  %388 = vst.msk [vmem:[#allocation2 + $0xd8] sm:$0x1] %vm378_vm2, %v4101_v1  ;;  %389 = vst.msk [vmem:[#allocation2 + $0x11] sm:$0x1] %vm378_vm2, %v4101_v1  ;;  %3875 = vmatpush3.bf16.msra.mxu1 %v3872_v22  ;;  %vm4439_vm4 = vcmp.eq.s32.totalorder %v1044_v14, 1 }
  0x29   : > { %3582 = vmatprep.mubr.msk.f32.mxu0 %vm486_vm1, %v471_v52  ;;  %391 = vst.msk [vmem:[#allocation2 + $0x41] sm:$0x1] %vm378_vm2, %v4101_v1  ;;  %392 = vst.msk [vmem:[#allocation2 + $0x59] sm:$0x1] %vm378_vm2, %v4101_v1  ;;  %3877 = vmatprep.subr.bf16.mxu1 %v4351_v25 }
  0x2a   : > { %393 = vst.msk [vmem:[#allocation2 + $0x71] sm:$0x1] %vm378_vm2, %v4101_v1  ;;  %394 = vst.msk [vmem:[#allocation2 + $0x89] sm:$0x1] %vm378_vm2, %v4101_v1 }
  0x2b   : > { %395 = vst.msk [vmem:[#allocation2 + $0xa1] sm:$0x1] %vm378_vm2, %v4101_v1  ;;  %396 = vst.msk [vmem:[#allocation2 + $0xb9] sm:$0x1] %vm378_vm2, %v4101_v1 }
  0x2c   : > { %3583 = vmatmul.mubr.msk.f32.gmra.mrb[8].mxu0 %vm486_vm1, %v472_v59  ;;  %397 = vst.msk [vmem:[#allocation2 + $0xd1] sm:$0x1] %vm378_vm2, %v4101_v1  ;;  %398 = vst.msk [vmem:[#allocation2 + $0xe9] sm:$0x1] %vm378_vm2, %v4101_v1 }
  0x2d   : > { %3585 = vmatprep.mubr.msk.f32.mxu0 %vm486_vm1, %v473_v62 }
  0x30   : > { %3586 = vmatmul.mubr.msk.f32.gmra.mrb[10].mxu0 %vm486_vm1, %v474_v5 }
  0x31   : > { %3588 = vmatprep.mubr.msk.f32.mxu0 %vm486_vm1, %v475_v8  ;;  %v372_v8 = vld [vmem:[%s4976_s7 + $0x60] sm:$0xff] }
  0x32   : > { %v4429_v21 = vpack.c.bf16 %v373_v9, %v372_v8 }
  0x34   : > { %3589 = vmatmul.mubr.msk.f32.gmra.mrb[12].mxu0 %vm486_vm1, %v476_v12 }
  0x35   : > { %3591 = vmatprep.mubr.msk.f32.mxu0 %vm486_vm1, %v477_v15 }
  0x38   : > { %3592 = vmatmul.mubr.msk.f32.gmra.mrb[14].mxu0 %vm486_vm1, %v478_v17 }
  0x39   : > { %3596 = vmatprep.mubr.msk.f32.mxu0 %vm486_vm1, %v789_v19 }
  0x3c   : > { %3597 = vmatmul.mubr.msk.f32.vlgmr.msra.gmra.mrb[16].mxu0 %vm486_vm1, %v790_v20 }
  0x3d   : > { %3859 = vmatpush3.bf16.msra.mxu0 %v3856_v28 }
  0x3e   : > { %3861 = vmatprep.subr.bf16.mxu0 %v4366_v31 }
  0xef   : > { %v3572_v33 = vpop.f32.mrb[0].mxu0 }
  0xf0   : > { %v611_v35 = vadd.f32 %v3572_v33, %v4372_v32  ;;  %v605_v36 = vpop.f32.mrb[1].mxu0 }
  0xf1   : > { %v606_v38 = vadd.f32 %v4372_v32, %v605_v36 }
  0xf2   : > { %v692_v39 = vmul.f32 %v4377_v34, %v611_v35 }
  0xf3   : > { %v691_v40 = vmul.f32 %v4377_v34, %v606_v38  ;;  %v3575_v41 = vpop.f32.mrb[2].mxu0 }
  0xf4   : > { %v715_v42 = vadd.f32 %v4383_v37, %v692_v39  ;;  %v621_v43 = vadd.f32 %v3575_v41, %v4372_v32  ;;  %v615_v44 = vpop.f32.mrb[3].mxu0 }
  0xf5   : > { %v714_v45 = vadd.f32 %v4383_v37, %v691_v40  ;;  %v616_v46 = vadd.f32 %v4372_v32, %v615_v44 }
  0xf6   : > { %v731_v47 = vmax.f32 %v715_v42, 0.0  ;;  %v694_v48 = vmul.f32 %v4377_v34, %v621_v43  ;;  %v3603_v62 = vpop.f32.mrb[0].mxu1 }
  0xf7   : > { %v730_v49 = vmax.f32 %v714_v45, 0.0  ;;  %v693_v50 = vmul.f32 %v4377_v34, %v616_v46  ;;  %v3578_v51 = vpop.f32.mrb[4].mxu0  ;;  %v1019_v4 = vadd.f32 %v3603_v62, %v4372_v32  ;;  %v1013_v5 = vpop.f32.mrb[1].mxu1 }
  0xf8   : > { %749 = vst.msk [vmem:[#allocation2 + $0x21] sm:$0xff] %vm747_vm3, %v731_v47  ;;  %v717_v52 = vadd.f32 %v4383_v37, %v694_v48  ;;  %v631_v53 = vadd.f32 %v3578_v51, %v4372_v32  ;;  %v625_v54 = vpop.f32.mrb[5].mxu0  ;;  %v1014_v10 = vadd.f32 %v4372_v32, %v1013_v5 }
  0xf9   : > { %748 = vst.msk [vmem:[#allocation2 + $0x19] sm:$0xff] %vm747_vm3, %v730_v49  ;;  %v716_v55 = vadd.f32 %v4383_v37, %v693_v50  ;;  %v626_v56 = vadd.f32 %v4372_v32, %v625_v54  ;;  %v1030_v13 = vmul.f32 %v4377_v34, %v1019_v4 }
  0xfa   : > { %v733_v57 = vmax.f32 %v717_v52, 0.0  ;;  %v696_v58 = vmul.f32 %v4377_v34, %v631_v53  ;;  %v1029_v18 = vmul.f32 %v4377_v34, %v1014_v10 }
  0xfb   : > { %v732_v59 = vmax.f32 %v716_v55, 0.0  ;;  %v695_v60 = vmul.f32 %v4377_v34, %v626_v56  ;;  %v3581_v61 = vpop.f32.mrb[6].mxu0  ;;  %v1039_v22 = vadd.f32 %v4383_v37, %v1030_v13 }
  0xfc   : > { %751 = vst.msk [vmem:[#allocation2 + $0x39] sm:$0xff] %vm747_vm3, %v733_v57  ;;  %v719_v63 = vadd.f32 %v4383_v37, %v696_v58  ;;  %v641_v0 = vadd.f32 %v3581_v61, %v4372_v32  ;;  %v635_v3 = vpop.f32.mrb[7].mxu0  ;;  %v1038_v28 = vadd.f32 %v4383_v37, %v1029_v18 }
  0xfd   : > { %750 = vst.msk [vmem:[#allocation2 + $0x31] sm:$0xff] %vm747_vm3, %v732_v59  ;;  %v718_v6 = vadd.f32 %v4383_v37, %v695_v60  ;;  %v636_v7 = vadd.f32 %v4372_v32, %v635_v3  ;;  %v1041_v33 = vmax.f32 %v1039_v22, 0.0 }
  0xfe   : > { %v735_v11 = vmax.f32 %v719_v63, 0.0  ;;  %v698_v12 = vmul.f32 %v4377_v34, %v641_v0  ;;  %v1040_v39 = vmax.f32 %v1038_v28, 0.0 }
  0xff   : > { %v734_v15 = vmax.f32 %v718_v6, 0.0  ;;  %v697_v16 = vmul.f32 %v4377_v34, %v636_v7  ;;  %v3584_v17 = vpop.f32.mrb[8].mxu0  ;;  %v4437_v26 = vld [vmem:[#allocation2 + $0x21] sm:$0xff]  ;;  %v1047_v44 = vsel %vm4439_vm4, %v1041_v33, 0.0 }
 0x100   : > { %753 = vst.msk [vmem:[#allocation2 + $0x51] sm:$0xff] %vm747_vm3, %v735_v11  ;;  %v721_v19 = vadd.f32 %v4383_v37, %v698_v12  ;;  %v651_v20 = vadd.f32 %v3584_v17, %v4372_v32  ;;  %v645_v1 = vpop.f32.mrb[9].mxu0  ;;  %v4427_v2 = vld [vmem:[#allocation2 + $0x19] sm:$0xff]  ;;  %1050 = vst.msk [vmem:[#allocation2 + $0xe1] sm:$0xff] %vm747_vm3, %v1047_v44  ;;  %v1046_v47 = vsel %vm4439_vm4, %v1040_v39, 0.0 }
 0x101   : > { %752 = vst.msk [vmem:[#allocation2 + $0x49] sm:$0xff] %vm747_vm3, %v734_v15  ;;  %v720_v23 = vadd.f32 %v4383_v37, %v697_v16  ;;  %v646_v24 = vadd.f32 %v4372_v32, %v645_v1  ;;  %3720 = vmatprep.mubr.msk.f32.mxu1 %vm747_vm3, %v4427_v2  ;;  %1049 = vst.msk [vmem:[#allocation2 + $0xd9] sm:$0xff] %vm747_vm3, %v1046_v47  ;;  %v364_v44 = vld [vmem:[%s4976_s7 + $0x20] sm:$0xff]  ;;  %v375_v47 = vld [vmem:[%s4976_s7 + $0x78] sm:$0xff] }
 0x102   : > { %v737_v29 = vmax.f32 %v721_v19, 0.0  ;;  %v700_v30 = vmul.f32 %v4377_v34, %v651_v20  ;;  %3721 = vmatmul.mubr.msk.f32.vlgmr.msra.gmra.mrb[2].mxu1 %vm747_vm3, %v4437_v26 }
 0x103   : > { %v736_v35 = vmax.f32 %v720_v23, 0.0  ;;  %v699_v36 = vmul.f32 %v4377_v34, %v646_v24  ;;  %v3587_v38 = vpop.f32.mrb[10].mxu0  ;;  %3879 = vmatpush3.bf16.msra.mxu1 %v4351_v25  ;;  %v4462_v46 = vld [vmem:[#allocation2 + $0x39] sm:$0xff]  ;;  %v901_v24 = vstv %s900_s26 }
 0x104   : > { %755 = vst.msk [vmem:[#allocation2 + $0x69] sm:$0xff] %vm747_vm3, %v737_v29  ;;  %v723_v40 = vadd.f32 %v4383_v37, %v700_v30  ;;  %v661_v41 = vadd.f32 %v3587_v38, %v4372_v32  ;;  %v655_v42 = vpop.f32.mrb[11].mxu0  ;;  %v4452_v43 = vld [vmem:[#allocation2 + $0x31] sm:$0xff]  ;;  %3881 = vmatprep.subr.bf16.mxu1 %v4429_v21  ;;  %vm902_vm5 = vcmp.eq.s32.totalorder %v901_v24, 1 }
 0x105   : > { %754 = vst.msk [vmem:[#allocation2 + $0x61] sm:$0xff] %vm747_vm3, %v736_v35  ;;  %v722_v45 = vadd.f32 %v4383_v37, %v699_v36  ;;  %v656_v25 = vadd.f32 %v4372_v32, %v655_v42  ;;  %3723 = vmatprep.mubr.msk.f32.mxu1 %vm747_vm3, %v4452_v43  ;;  %v4553_v42 = vld [vmem:[#allocation2 + $0x1a] sm:$0xff] }
 0x106   : > { %v739_v48 = vmax.f32 %v723_v40, 0.0  ;;  %v702_v49 = vmul.f32 %v4377_v34, %v661_v41  ;;  %3724 = vmatmul.mubr.msk.f32.gmra.mrb[4].mxu1 %vm747_vm3, %v4462_v46 }
 0x107   : > { %v738_v50 = vmax.f32 %v722_v45, 0.0  ;;  %v701_v51 = vmul.f32 %v4377_v34, %v656_v25  ;;  %v3590_v52 = vpop.f32.mrb[12].mxu0  ;;  %v4482_v59 = vld [vmem:[#allocation2 + $0x51] sm:$0xff]  ;;  %v365_v45 = vld [vmem:[%s4976_s7 + $0x28] sm:$0xff] }
 0x108   : > { %757 = vst.msk [vmem:[#allocation2 + $0x81] sm:$0xff] %vm747_vm3, %v739_v48  ;;  %v725_v53 = vadd.f32 %v4383_v37, %v702_v49  ;;  %v671_v54 = vadd.f32 %v3590_v52, %v4372_v32  ;;  %v665_v55 = vpop.f32.mrb[13].mxu0  ;;  %v4475_v56 = vld [vmem:[#allocation2 + $0x49] sm:$0xff]  ;;  %v4576_v52 = vld [vmem:[#allocation2 + $0x32] sm:$0xff] }
 0x109   : > { %756 = vst.msk [vmem:[#allocation2 + $0x79] sm:$0xff] %vm747_vm3, %v738_v50  ;;  %v724_v57 = vadd.f32 %v4383_v37, %v701_v51  ;;  %v666_v58 = vadd.f32 %v4372_v32, %v665_v55  ;;  %3726 = vmatprep.mubr.msk.f32.mxu1 %vm747_vm3, %v4475_v56  ;;  %v374_v25 = vld [vmem:[%s4976_s7 + $0x70] sm:$0xff]  ;;  %v4569_v49 = vld [vmem:[#allocation2 + $0x22] sm:$0xff]  ;;  %v4571_v50 = vpack.c.bf16 %v365_v45, %v364_v44 }
 0x10a   : > { %v741_v60 = vmax.f32 %v725_v53, 0.0  ;;  %v704_v61 = vmul.f32 %v4377_v34, %v671_v54  ;;  %3727 = vmatmul.mubr.msk.f32.gmra.mrb[6].mxu1 %vm747_vm3, %v4482_v59  ;;  %v4578_v53 = vpack.c.bf16 %v375_v47, %v374_v25  ;;  %v4587_v54 = vld [vmem:[#allocation2 + $0x3a] sm:$0xff]  ;;  %v4592_v55 = vld [vmem:[#allocation2 + $0x4a] sm:$0xff] }
 0x10b   : > { %v740_v62 = vmax.f32 %v724_v57, 0.0  ;;  %v703_v63 = vmul.f32 %v4377_v34, %v666_v58  ;;  %v3593_v0 = vpop.f32.mrb[14].mxu0  ;;  %v4499_v9 = vld [vmem:[#allocation2 + $0x69] sm:$0xff] }
 0x10c   : > { %759 = vst.msk [vmem:[#allocation2 + $0x99] sm:$0xff] %vm747_vm3, %v741_v60  ;;  %v727_v3 = vadd.f32 %v4383_v37, %v704_v61  ;;  %v681_v4 = vadd.f32 %v3593_v0, %v4372_v32  ;;  %v675_v5 = vpop.f32.mrb[15].mxu0  ;;  %v4492_v6 = vld [vmem:[#allocation2 + $0x61] sm:$0xff] }
 0x10d   : > { %758 = vst.msk [vmem:[#allocation2 + $0x91] sm:$0xff] %vm747_vm3, %v740_v62  ;;  %v726_v7 = vadd.f32 %v4383_v37, %v703_v63  ;;  %v676_v8 = vadd.f32 %v4372_v32, %v675_v5  ;;  %3729 = vmatprep.mubr.msk.f32.mxu1 %vm747_vm3, %v4492_v6  ;;  %v367_v5 = vld [vmem:[%s4976_s7 + $0x38] sm:$0xff] }
 0x10e   : > { %v743_v10 = vmax.f32 %v727_v3, 0.0  ;;  %v706_v11 = vmul.f32 %v4377_v34, %v681_v4  ;;  %3730 = vmatmul.mubr.msk.f32.gmra.mrb[8].mxu1 %vm747_vm3, %v4499_v9  ;;  %v4665_v3 = vld [vmem:[#allocation2 + $0x30] sm:$0xff] }
 0x10f   : > { %v742_v12 = vmax.f32 %v726_v7, 0.0  ;;  %v705_v13 = vmul.f32 %v4377_v34, %v676_v8  ;;  %v3598_v14 = vpop.f32.mrb[16].mxu0  ;;  %v4517_v1 = vld [vmem:[#allocation2 + $0x81] sm:$0xff]  ;;  %v366_v4 = vld [vmem:[%s4976_s7 + $0x30] sm:$0xff] }
 0x110   : > { %761 = vst.msk [vmem:[#allocation2 + $0xb1] sm:$0xff] %vm747_vm3, %v743_v10  ;;  %v729_v15 = vadd.f32 %v4383_v37, %v706_v11  ;;  %v876_v16 = vadd.f32 %v3598_v14, %v4372_v32  ;;  %v870_v17 = vpop.f32.mrb[17].mxu0  ;;  %v4510_v18 = vld [vmem:[#allocation2 + $0x79] sm:$0xff]  ;;  %v4625_v57 = vld [vmem:[#allocation2 + $0x82] sm:$0xff] }
 0x111   : > { %760 = vst.msk [vmem:[#allocation2 + $0xa9] sm:$0xff] %vm747_vm3, %v742_v12  ;;  %v728_v19 = vadd.f32 %v4383_v37, %v705_v13  ;;  %v871_v20 = vadd.f32 %v4372_v32, %v870_v17  ;;  %3732 = vmatprep.mubr.msk.f32.mxu1 %vm747_vm3, %v4510_v18  ;;  %v376_v8 = vld [vmem:[%s4976_s7 + $0x80] sm:$0xff]  ;;  %v377_v10 = vld [vmem:[%s4976_s7 + $0x88] sm:$0xff]  ;;  %v4684_v11 = vld [vmem:[#allocation2 + $0x38] sm:$0xff]  ;;  %v3868_v12 = vpack.c.bf16 %v367_v5, %v366_v4 }
 0x112   : > { %v745_v22 = vmax.f32 %v729_v15, 0.0  ;;  %v887_v23 = vmul.f32 %v4377_v34, %v876_v16  ;;  %3733 = vmatmul.mubr.msk.f32.gmra.mrb[10].mxu1 %vm747_vm3, %v4517_v1  ;;  %v4688_v14 = vld [vmem:[#allocation2 + $0x48] sm:$0xff]  ;;  %v3888_v15 = vpack.c.bf16 %v377_v10, %v376_v8  ;;  %v4695_v16 = vld [vmem:[#allocation2 + $0x18] sm:$0xff]  ;;  %v4699_v17 = vld [vmem:[#allocation2 + $0x50] sm:$0xff] }
 0x113   : > { %v744_v27 = vmax.f32 %v728_v19, 0.0  ;;  %v886_v28 = vmul.f32 %v4377_v34, %v871_v20  ;;  %v4531_v33 = vld [vmem:[#allocation2 + $0x99] sm:$0xff] }
 0x114   : > { %763 = vst.msk [vmem:[#allocation2 + $0xc9] sm:$0xff] %vm747_vm3, %v745_v22  ;;  %v896_v29 = vadd.f32 %v4383_v37, %v887_v23  ;;  %v4525_v32 = vld [vmem:[#allocation2 + $0x91] sm:$0xff]  ;;  %v4637_v60 = vld [vmem:[#allocation2 + $0x9a] sm:$0xff]  ;;  %v4713_v22 = vld [vmem:[#allocation2 + $0x68] sm:$0xff] }
 0x115   : > { %762 = vst.msk [vmem:[#allocation2 + $0xc1] sm:$0xff] %vm747_vm3, %v744_v27  ;;  %v895_v30 = vadd.f32 %v4383_v37, %v886_v28  ;;  %3735 = vmatprep.mubr.msk.f32.mxu1 %vm747_vm3, %v4525_v32  ;;  %v4629_v58 = vld [vmem:[#allocation2 + $0x92] sm:$0xff]  ;;  %v4703_v19 = vld [vmem:[#allocation2 + $0x20] sm:$0xff] }
 0x116   : > { %v898_v35 = vmax.f32 %v896_v29, 0.0  ;;  %3736 = vmatmul.mubr.msk.f32.gmra.mrb[12].mxu1 %vm747_vm3, %v4531_v33  ;;  %v4705_v20 = vld [vmem:[#allocation2 + $0x60] sm:$0xff]  ;;  %v4717_v23 = vld [vmem:[#allocation2 + $0x78] sm:$0xff]  ;;  %v4729_v27 = vld [vmem:[#allocation2 + $0x90] sm:$0xff] }
 0x117   : > { %v897_v34 = vmax.f32 %v895_v30, 0.0  ;;  %v4540_v37 = vld [vmem:[#allocation2 + $0xb1] sm:$0xff]  ;;  %v4725_v24 = vld [vmem:[#allocation2 + $0x80] sm:$0xff] }
 0x118   : > { %v904_v36 = vsel %vm902_vm5, %v898_v35, 0.0  ;;  %v4535_v38 = vld [vmem:[#allocation2 + $0xa9] sm:$0xff]  ;;  %v4649_v62 = vld [vmem:[#allocation2 + $0xb2] sm:$0xff] }
 0x119   : > { %906 = vst.msk [vmem:[#allocation2 + $0x9] sm:$0xff] %vm747_vm3, %v904_v36  ;;  %v903_v39 = vsel %vm902_vm5, %v897_v34, 0.0  ;;  %3738 = vmatprep.mubr.msk.f32.mxu1 %vm747_vm3, %v4535_v38  ;;  %v4641_v61 = vld [vmem:[#allocation2 + $0xaa] sm:$0xff]  ;;  %v4737_v28 = vld [vmem:[#allocation2 + $0x98] sm:$0xff] }
 0x11a   : > { %905 = vst.msk [vmem:[#allocation2 + $0x1] sm:$0xff] %vm747_vm3, %v903_v39  ;;  %3739 = vmatmul.mubr.msk.f32.gmra.mrb[14].mxu1 %vm747_vm3, %v4540_v37  ;;  %v4741_v29 = vld [vmem:[#allocation2 + $0xa8] sm:$0xff]  ;;  %v4749_v30 = vld [vmem:[#allocation2 + $0xb0] sm:$0xff]  ;;  %v2384_v34 = vld [vmem:[#allocation2 + $0xd8] sm:$0xff] }
 0x11b   : > { %v4549_v41 = vld [vmem:[#allocation2 + $0xc9] sm:$0xff]  ;;  %v2385_v39 = vld [vmem:[#allocation2 + $0xe0] sm:$0xff] }
 0x11c   : > { %v4545_v40 = vld [vmem:[#allocation2 + $0xc1] sm:$0xff]  ;;  %v4661_v0 = vld [vmem:[#allocation2 + $0xca] sm:$0xff] }
 0x11d   : > { %3741 = vmatprep.mubr.msk.f32.mxu1 %vm747_vm3, %v4545_v40  ;;  %v4653_v63 = vld [vmem:[#allocation2 + $0xc2] sm:$0xff] }
 0x11e   : > { %3742 = vmatmul.mubr.msk.f32.gmra.mrb[16].mxu1 %vm747_vm3, %v4549_v41  ;;  %v4753_v35 = vld [vmem:[#allocation2 + $0xc0] sm:$0xff]  ;;  %v4761_v36 = vld [vmem:[#allocation2 + $0xc8] sm:$0xff] }
 0x11f   : > { %3748 = vmatprep.mubr.msk.f32.mxu1 %vm747_vm3, %v4553_v42 }
 0x120   : > { %v1068_v51 = vld [vmem:[#allocation2 + $0x9] sm:$0xff] }
 0x121   : > { %v1067_v48 = vld [vmem:[#allocation2 + $0x1] sm:$0xff]  ;;  %v1470_v45 = vld [vmem:[#allocation2 + $0xa] sm:$0xff] }
 0x122   : > { %3608 = vmatprep.mubr.msk.f32.mxu0 %vm747_vm3, %v1067_v48  ;;  %3749 = vmatmul.mubr.msk.f32.vlgmr.msra.gmra.mrb[2].mxu1 %vm747_vm3, %v4569_v49  ;;  %v1051_v7 = vld [vmem:[#allocation2] sm:$0xff]  ;;  %v1052_v13 = vld [vmem:[#allocation2 + $0x8] sm:$0xff] }
 0x123   : > { %3609 = vmatmul.mubr.msk.f32.vlgmr.msra.gmra.mrb[18].mxu0 %vm747_vm3, %v1068_v51  ;;  %3751 = vmatprep.mubr.msk.f32.mxu1 %vm747_vm3, %v4576_v52  ;;  %v1469_v44 = vld [vmem:[#allocation2 + $0x2] sm:$0xff] }
 0x124   : > { %3863 = vmatpush3.bf16.msra.mxu0 %v4366_v31  ;;  %3883 = vmatpush3.bf16.msra.mxu1 %v4429_v21  ;;  %v4601_v31 = vld [vmem:[#allocation2 + $0x52] sm:$0xff]  ;;  %v4613_v21 = vld [vmem:[#allocation2 + $0x6a] sm:$0xff] }
 0x125   : > { %3611 = vmatprep.mubr.msk.f32.mxu0 %vm747_vm3, %v4427_v2  ;;  %3865 = vmatprep.subr.bf16.mxu0 %v4571_v50  ;;  %v4605_v2 = vld [vmem:[#allocation2 + $0x62] sm:$0xff] }
 0x126   : > { %3752 = vmatmul.mubr.msk.f32.gmra.mrb[4].mxu1 %vm747_vm3, %v4587_v54  ;;  %3885 = vmatprep.subr.bf16.mxu1 %v4578_v53 }
 0x127   : > { %3612 = vmatmul.mubr.msk.f32.gmra.mrb[20].mxu0 %vm747_vm3, %v4437_v26  ;;  %3754 = vmatprep.mubr.msk.f32.mxu1 %vm747_vm3, %v4592_v55  ;;  %v4617_v26 = vld [vmem:[#allocation2 + $0x7a] sm:$0xff] }
 0x128   : > { %3614 = vmatprep.mubr.msk.f32.mxu0 %vm747_vm3, %v4452_v43 }
 0x12a   : > { %3755 = vmatmul.mubr.msk.f32.gmra.mrb[6].mxu1 %vm747_vm3, %v4601_v31 }
 0x12b   : > { %3615 = vmatmul.mubr.msk.f32.gmra.mrb[22].mxu0 %vm747_vm3, %v4462_v46  ;;  %3757 = vmatprep.mubr.msk.f32.mxu1 %vm747_vm3, %v4605_v2 }
 0x12c   : > { %3617 = vmatprep.mubr.msk.f32.mxu0 %vm747_vm3, %v4475_v56 }
 0x12e   : > { %3758 = vmatmul.mubr.msk.f32.gmra.mrb[8].mxu1 %vm747_vm3, %v4613_v21 }
 0x12f   : > { %3618 = vmatmul.mubr.msk.f32.gmra.mrb[24].mxu0 %vm747_vm3, %v4482_v59  ;;  %3760 = vmatprep.mubr.msk.f32.mxu1 %vm747_vm3, %v4617_v26 }
 0x130   : > { %3620 = vmatprep.mubr.msk.f32.mxu0 %vm747_vm3, %v4492_v6 }
 0x132   : > { %3761 = vmatmul.mubr.msk.f32.gmra.mrb[10].mxu1 %vm747_vm3, %v4625_v57 }
 0x133   : > { %3621 = vmatmul.mubr.msk.f32.gmra.mrb[26].mxu0 %vm747_vm3, %v4499_v9  ;;  %3763 = vmatprep.mubr.msk.f32.mxu1 %vm747_vm3, %v4629_v58 }
 0x134   : > { %3623 = vmatprep.mubr.msk.f32.mxu0 %vm747_vm3, %v4510_v18 }
 0x136   : > { %3764 = vmatmul.mubr.msk.f32.gmra.mrb[12].mxu1 %vm747_vm3, %v4637_v60 }
 0x137   : > { %3624 = vmatmul.mubr.msk.f32.gmra.mrb[28].mxu0 %vm747_vm3, %v4517_v1  ;;  %3766 = vmatprep.mubr.msk.f32.mxu1 %vm747_vm3, %v4641_v61 }
 0x138   : > { %3626 = vmatprep.mubr.msk.f32.mxu0 %vm747_vm3, %v4525_v32 }
 0x13a   : > { %3767 = vmatmul.mubr.msk.f32.gmra.mrb[14].mxu1 %vm747_vm3, %v4649_v62 }
 0x13b   : > { %3627 = vmatmul.mubr.msk.f32.gmra.mrb[30].mxu0 %vm747_vm3, %v4531_v33  ;;  %3769 = vmatprep.mubr.msk.f32.mxu1 %vm747_vm3, %v4653_v63 }
 0x13c   : > { %3629 = vmatprep.mubr.msk.f32.mxu0 %vm747_vm3, %v4535_v38 }
 0x13e   : > { %3770 = vmatmul.mubr.msk.f32.gmra.mrb[16].mxu1 %vm747_vm3, %v4661_v0 }
 0x13f   : > { %3630 = vmatmul.mubr.msk.f32.gmra.mrb[32].mxu0 %vm747_vm3, %v4540_v37  ;;  %3776 = vmatprep.mubr.msk.f32.mxu1 %vm747_vm3, %v4665_v3 }
 0x140   : > { %3636 = vmatprep.mubr.msk.f32.mxu0 %vm747_vm3, %v1051_v7 }
 0x142   : > { %3777 = vmatmul.mubr.msk.f32.vlgmr.msra.gmra.mrb[2].mxu1 %vm747_vm3, %v4684_v11 }
 0x143   : > { %3637 = vmatmul.mubr.msk.f32.vlgmr.msra.gmra.mrb[18].mxu0 %vm747_vm3, %v1052_v13  ;;  %3779 = vmatprep.mubr.msk.f32.mxu1 %vm747_vm3, %v4688_v14 }
 0x144   : > { %3867 = vmatpush3.bf16.msra.mxu0 %v4571_v50  ;;  %3887 = vmatpush3.bf16.msra.mxu1 %v4578_v53 }
 0x145   : > { %3639 = vmatprep.mubr.msk.f32.mxu0 %vm747_vm3, %v4695_v16  ;;  %3869 = vmatprep.subr.bf16.mxu0 %v3868_v12 }
 0x146   : > { %3780 = vmatmul.mubr.msk.f32.gmra.mrb[4].mxu1 %vm747_vm3, %v4699_v17  ;;  %3889 = vmatprep.subr.bf16.mxu1 %v3888_v15 }
 0x147   : > { %3640 = vmatmul.mubr.msk.f32.gmra.mrb[20].mxu0 %vm747_vm3, %v4703_v19  ;;  %3782 = vmatprep.mubr.msk.f32.mxu1 %vm747_vm3, %v4705_v20 }
 0x148   : > { %3642 = vmatprep.mubr.msk.f32.mxu0 %vm747_vm3, %v4665_v3 }
 0x14a   : > { %3783 = vmatmul.mubr.msk.f32.gmra.mrb[6].mxu1 %vm747_vm3, %v4713_v22 }
 0x14b   : > { %3643 = vmatmul.mubr.msk.f32.gmra.mrb[22].mxu0 %vm747_vm3, %v4684_v11  ;;  %3785 = vmatprep.mubr.msk.f32.mxu1 %vm747_vm3, %v4717_v23 }
 0x14c   : > { %3645 = vmatprep.mubr.msk.f32.mxu0 %vm747_vm3, %v4688_v14 }
 0x14e   : > { %3786 = vmatmul.mubr.msk.f32.gmra.mrb[8].mxu1 %vm747_vm3, %v4725_v24 }
 0x14f   : > { %3646 = vmatmul.mubr.msk.f32.gmra.mrb[24].mxu0 %vm747_vm3, %v4699_v17  ;;  %3788 = vmatprep.mubr.msk.f32.mxu1 %vm747_vm3, %v4729_v27 }
 0x150   : > { %3648 = vmatprep.mubr.msk.f32.mxu0 %vm747_vm3, %v4705_v20 }
 0x152   : > { %3789 = vmatmul.mubr.msk.f32.gmra.mrb[10].mxu1 %vm747_vm3, %v4737_v28 }
 0x153   : > { %3649 = vmatmul.mubr.msk.f32.gmra.mrb[26].mxu0 %vm747_vm3, %v4713_v22  ;;  %3791 = vmatprep.mubr.msk.f32.mxu1 %vm747_vm3, %v4741_v29 }
 0x154   : > { %3651 = vmatprep.mubr.msk.f32.mxu0 %vm747_vm3, %v4717_v23 }
 0x156   : > { %3792 = vmatmul.mubr.msk.f32.gmra.mrb[12].mxu1 %vm747_vm3, %v4749_v30 }
 0x157   : > { %3652 = vmatmul.mubr.msk.f32.gmra.mrb[28].mxu0 %vm747_vm3, %v4725_v24  ;;  %3794 = vmatprep.mubr.msk.f32.mxu1 %vm747_vm3, %v4753_v35 }
 0x158   : > { %3654 = vmatprep.mubr.msk.f32.mxu0 %vm747_vm3, %v4729_v27 }
 0x15a   : > { %3795 = vmatmul.mubr.msk.f32.gmra.mrb[14].mxu1 %vm747_vm3, %v4761_v36 }
 0x15b   : > { %3655 = vmatmul.mubr.msk.f32.gmra.mrb[30].mxu0 %vm747_vm3, %v4737_v28  ;;  %3797 = vmatprep.mubr.msk.f32.mxu1 %vm747_vm3, %v2384_v34 }
 0x15c   : > { %3657 = vmatprep.mubr.msk.f32.mxu0 %vm747_vm3, %v4741_v29 }
 0x15e   : > { %3798 = vmatmul.mubr.msk.f32.gmra.mrb[16].mxu1 %vm747_vm3, %v2385_v39 }
 0x15f   : > { %3658 = vmatmul.mubr.msk.f32.gmra.mrb[32].mxu0 %vm747_vm3, %v4749_v30  ;;  %3804 = vmatprep.mubr.msk.f32.mxu1 %vm747_vm3, %v4452_v43  ;;  %v2609_v43 = vld [vmem:[#allocation2 + $0xd9] sm:$0xff] }
 0x160   : > { %3664 = vmatprep.mubr.msk.f32.mxu0 %vm747_vm3, %v1469_v44 }
 0x162   : > { %3805 = vmatmul.mubr.msk.f32.vlgmr.msra.gmra.mrb[2].mxu1 %vm747_vm3, %v4462_v46  ;;  %v2610_v46 = vld [vmem:[#allocation2 + $0xe1] sm:$0xff] }
 0x163   : > { %3665 = vmatmul.mubr.msk.f32.vlgmr.msra.gmra.mrb[18].mxu0 %vm747_vm3, %v1470_v45  ;;  %3807 = vmatprep.mubr.msk.f32.mxu1 %vm747_vm3, %v4475_v56  ;;  %v2834_v56 = vld [vmem:[#allocation2 + $0xda] sm:$0xff] }
 0x164   : > { %3871 = vmatpush3.bf16.msra.mxu0 %v3868_v12  ;;  %3891 = vmatpush3.bf16.msra.mxu1 %v3888_v15 }
 0x165   : > { %3667 = vmatprep.mubr.msk.f32.mxu0 %vm747_vm3, %v4553_v42 }
 0x166   : > { %3808 = vmatmul.mubr.msk.f32.gmra.mrb[4].mxu1 %vm747_vm3, %v4482_v59  ;;  %v2835_v59 = vld [vmem:[#allocation2 + $0xe2] sm:$0xff] }
 0x167   : > { %3668 = vmatmul.mubr.msk.f32.gmra.mrb[20].mxu0 %vm747_vm3, %v4569_v49  ;;  %3810 = vmatprep.mubr.msk.f32.mxu1 %vm747_vm3, %v4492_v6 }
 0x168   : > { %3670 = vmatprep.mubr.msk.f32.mxu0 %vm747_vm3, %v4576_v52 }
 0x16a   : > { %3811 = vmatmul.mubr.msk.f32.gmra.mrb[6].mxu1 %vm747_vm3, %v4499_v9 }
 0x16b   : > { %3671 = vmatmul.mubr.msk.f32.gmra.mrb[22].mxu0 %vm747_vm3, %v4587_v54  ;;  %3813 = vmatprep.mubr.msk.f32.mxu1 %vm747_vm3, %v4510_v18  ;;  %v4899_v18 = vld [vmem:[%s4977_s8] ss:$0 sm:$0xff] }
 0x16c   : > { %3673 = vmatprep.mubr.msk.f32.mxu0 %vm747_vm3, %v4592_v55 }
 0x16e   : > { %3814 = vmatmul.mubr.msk.f32.gmra.mrb[8].mxu1 %vm747_vm3, %v4517_v1 }
 0x16f   : > { %3674 = vmatmul.mubr.msk.f32.gmra.mrb[24].mxu0 %vm747_vm3, %v4601_v31  ;;  %3816 = vmatprep.mubr.msk.f32.mxu1 %vm747_vm3, %v4525_v32 }
 0x170   : > { %3676 = vmatprep.mubr.msk.f32.mxu0 %vm747_vm3, %v4605_v2 }
 0x172   : > { %3817 = vmatmul.mubr.msk.f32.gmra.mrb[10].mxu1 %vm747_vm3, %v4531_v33 }
 0x173   : > { %3677 = vmatmul.mubr.msk.f32.gmra.mrb[26].mxu0 %vm747_vm3, %v4613_v21  ;;  %3819 = vmatprep.mubr.msk.f32.mxu1 %vm747_vm3, %v4535_v38 }
 0x174   : > { %3679 = vmatprep.mubr.msk.f32.mxu0 %vm747_vm3, %v4617_v26 }
 0x176   : > { %3820 = vmatmul.mubr.msk.f32.gmra.mrb[12].mxu1 %vm747_vm3, %v4540_v37 }
 0x177   : > { %3680 = vmatmul.mubr.msk.f32.gmra.mrb[28].mxu0 %vm747_vm3, %v4625_v57  ;;  %3822 = vmatprep.mubr.msk.f32.mxu1 %vm747_vm3, %v4545_v40 }
 0x178   : > { %3682 = vmatprep.mubr.msk.f32.mxu0 %vm747_vm3, %v4629_v58 }
 0x17a   : > { %3823 = vmatmul.mubr.msk.f32.gmra.mrb[14].mxu1 %vm747_vm3, %v4549_v41 }
 0x17b   : > { %3683 = vmatmul.mubr.msk.f32.gmra.mrb[30].mxu0 %vm747_vm3, %v4637_v60  ;;  %3825 = vmatprep.mubr.msk.f32.mxu1 %vm747_vm3, %v2609_v43 }
 0x17c   : > { %3685 = vmatprep.mubr.msk.f32.mxu0 %vm747_vm3, %v4641_v61 }
 0x17e   : > { %3826 = vmatmul.mubr.msk.f32.gmra.mrb[16].mxu1 %vm747_vm3, %v2610_v46 }
 0x17f   : > { %3686 = vmatmul.mubr.msk.f32.gmra.mrb[32].mxu0 %vm747_vm3, %v4649_v62  ;;  %3832 = vmatprep.mubr.msk.f32.mxu1 %vm747_vm3, %v4576_v52 }
 0x180   : > { %3692 = vmatprep.mubr.msk.f32.mxu0 %vm747_vm3, %v4695_v16 }
 0x182   : > { %3833 = vmatmul.mubr.msk.f32.vlgmr.msra.gmra.mrb[2].mxu1 %vm747_vm3, %v4587_v54 }
 0x183   : > { %3693 = vmatmul.mubr.msk.f32.vlgmr.msra.gmra.mrb[18].mxu0 %vm747_vm3, %v4703_v19  ;;  %3835 = vmatprep.mubr.msk.f32.mxu1 %vm747_vm3, %v4592_v55 }
 0x184   : > { %3695 = vmatprep.mubr.msk.f32.mxu0 %vm747_vm3, %v4665_v3 }
 0x186   : > { %3836 = vmatmul.mubr.msk.f32.gmra.mrb[4].mxu1 %vm747_vm3, %v4601_v31 }
 0x187   : > { %3696 = vmatmul.mubr.msk.f32.gmra.mrb[20].mxu0 %vm747_vm3, %v4684_v11  ;;  %3838 = vmatprep.mubr.msk.f32.mxu1 %vm747_vm3, %v4605_v2 }
 0x188   : > { %3698 = vmatprep.mubr.msk.f32.mxu0 %vm747_vm3, %v4688_v14 }
 0x18a   : > { %3839 = vmatmul.mubr.msk.f32.gmra.mrb[6].mxu1 %vm747_vm3, %v4613_v21 }
 0x18b   : > { %3699 = vmatmul.mubr.msk.f32.gmra.mrb[22].mxu0 %vm747_vm3, %v4699_v17  ;;  %3841 = vmatprep.mubr.msk.f32.mxu1 %vm747_vm3, %v4617_v26 }
 0x18c   : > { %3701 = vmatprep.mubr.msk.f32.mxu0 %vm747_vm3, %v4705_v20 }
 0x18e   : > { %3842 = vmatmul.mubr.msk.f32.gmra.mrb[8].mxu1 %vm747_vm3, %v4625_v57 }
 0x18f   : > { %3702 = vmatmul.mubr.msk.f32.gmra.mrb[24].mxu0 %vm747_vm3, %v4713_v22  ;;  %3844 = vmatprep.mubr.msk.f32.mxu1 %vm747_vm3, %v4629_v58 }
 0x190   : > { %3704 = vmatprep.mubr.msk.f32.mxu0 %vm747_vm3, %v4717_v23 }
 0x192   : > { %3845 = vmatmul.mubr.msk.f32.gmra.mrb[10].mxu1 %vm747_vm3, %v4637_v60 }
 0x193   : > { %3705 = vmatmul.mubr.msk.f32.gmra.mrb[26].mxu0 %vm747_vm3, %v4725_v24  ;;  %3847 = vmatprep.mubr.msk.f32.mxu1 %vm747_vm3, %v4641_v61 }
 0x194   : > { %3707 = vmatprep.mubr.msk.f32.mxu0 %vm747_vm3, %v4729_v27 }
 0x196   : > { %3848 = vmatmul.mubr.msk.f32.gmra.mrb[12].mxu1 %vm747_vm3, %v4649_v62 }
 0x197   : > { %3708 = vmatmul.mubr.msk.f32.gmra.mrb[28].mxu0 %vm747_vm3, %v4737_v28  ;;  %3850 = vmatprep.mubr.msk.f32.mxu1 %vm747_vm3, %v4653_v63 }
 0x198   : > { %3710 = vmatprep.mubr.msk.f32.mxu0 %vm747_vm3, %v4741_v29 }
 0x19a   : > { %3851 = vmatmul.mubr.msk.f32.gmra.mrb[14].mxu1 %vm747_vm3, %v4661_v0 }
 0x19b   : > { %3711 = vmatmul.mubr.msk.f32.gmra.mrb[30].mxu0 %vm747_vm3, %v4749_v30  ;;  %3853 = vmatprep.mubr.msk.f32.mxu1 %vm747_vm3, %v2834_v56 }
 0x19c   : > { %3713 = vmatprep.mubr.msk.f32.mxu0 %vm747_vm3, %v4753_v35 }
 0x19e   : > { %3854 = vmatmul.mubr.msk.f32.gmra.mrb[16].mxu1 %vm747_vm3, %v2835_v59 }
 0x19f   : > { %3714 = vmatmul.mubr.msk.f32.gmra.mrb[32].mxu0 %vm747_vm3, %v4761_v36 }
 0x255   : > { %v3834_v6 = vpop.f32.mrb[2].mxu1 }
 0x256   : > { %v3694_v9 = vpop.f32.mrb[18].mxu0  ;;  %v2950_v1 = vpop.f32.mrb[3].mxu1 }
 0x257   : > { %v3892_v32 = vadd.f32 %v3834_v6, %v3694_v9  ;;  %v1824_v33 = vpop.f32.mrb[19].mxu0 }
 0x258   : > { %v3893_v38 = vadd.f32 %v2950_v1, %v1824_v33 }
 0x259   : > { %v3053_v37 = vadd.f32 %v3892_v32, %v4899_v18  ;;  %v3837_v40 = vpop.f32.mrb[4].mxu1 }
 0x25a   : > { %v3052_v41 = vadd.f32 %v3893_v38, %v4899_v18  ;;  %v3697_v42 = vpop.f32.mrb[20].mxu0  ;;  %v2960_v25 = vpop.f32.mrb[5].mxu1 }
 0x25b   : > { %3069 = vst.msk [vmem:[%s4904_s10 + $0x8] sm:$0xff] %vm486_vm1, %v3053_v37  ;;  %v3894_v47 = vadd.f32 %v3837_v40, %v3697_v42  ;;  %v1834_v48 = vpop.f32.mrb[21].mxu0 }
 0x25c   : > { %3068 = vst.msk [vmem:[%s4904_s10] sm:$0xff] %vm486_vm1, %v3052_v41  ;;  %v3895_v49 = vadd.f32 %v2960_v25, %v1834_v48 }
 0x25d   : > { %v3055_v50 = vadd.f32 %v3894_v47, %v4899_v18  ;;  %v3840_v51 = vpop.f32.mrb[6].mxu1 }
 0x25e   : > { %v3054_v52 = vadd.f32 %v3895_v49, %v4899_v18  ;;  %v3700_v53 = vpop.f32.mrb[22].mxu0  ;;  %v2970_v54 = vpop.f32.mrb[7].mxu1 }
 0x25f   : > { %3071 = vst.msk [vmem:[%s4904_s10 + $0x18] sm:$0xff] %vm486_vm1, %v3055_v50  ;;  %v3896_v55 = vadd.f32 %v3840_v51, %v3700_v53  ;;  %v1844_v31 = vpop.f32.mrb[23].mxu0 }
 0x260   : > { %3070 = vst.msk [vmem:[%s4904_s10 + $0x10] sm:$0xff] %vm486_vm1, %v3054_v52  ;;  %v3897_v2 = vadd.f32 %v2970_v54, %v1844_v31 }
 0x261   : > { %v3057_v21 = vadd.f32 %v3896_v55, %v4899_v18  ;;  %v3843_v26 = vpop.f32.mrb[8].mxu1 }
 0x262   : > { %v3056_v57 = vadd.f32 %v3897_v2, %v4899_v18  ;;  %v3703_v58 = vpop.f32.mrb[24].mxu0  ;;  %v2980_v60 = vpop.f32.mrb[9].mxu1 }
 0x263   : > { %3073 = vst.msk [vmem:[%s4904_s10 + $0x28] sm:$0xff] %vm486_vm1, %v3057_v21  ;;  %v3898_v61 = vadd.f32 %v3843_v26, %v3703_v58  ;;  %v1854_v62 = vpop.f32.mrb[25].mxu0 }
 0x264   : > { %3072 = vst.msk [vmem:[%s4904_s10 + $0x20] sm:$0xff] %vm486_vm1, %v3056_v57  ;;  %v3899_v63 = vadd.f32 %v2980_v60, %v1854_v62 }
 0x265   : > { %v3059_v0 = vadd.f32 %v3898_v61, %v4899_v18  ;;  %v3846_v3 = vpop.f32.mrb[10].mxu1 }
 0x266   : > { %v3058_v4 = vadd.f32 %v3899_v63, %v4899_v18  ;;  %v3706_v5 = vpop.f32.mrb[26].mxu0  ;;  %v2990_v7 = vpop.f32.mrb[11].mxu1 }
 0x267   : > { %3075 = vst.msk [vmem:[%s4904_s10 + $0x38] sm:$0xff] %vm486_vm1, %v3059_v0  ;;  %v3900_v8 = vadd.f32 %v3846_v3, %v3706_v5  ;;  %v1864_v10 = vpop.f32.mrb[27].mxu0 }
 0x268   : > { %3074 = vst.msk [vmem:[%s4904_s10 + $0x30] sm:$0xff] %vm486_vm1, %v3058_v4  ;;  %v3901_v11 = vadd.f32 %v2990_v7, %v1864_v10 }
 0x269   : > { %v3061_v12 = vadd.f32 %v3900_v8, %v4899_v18  ;;  %v3849_v13 = vpop.f32.mrb[12].mxu1 }
 0x26a   : > { %v3060_v14 = vadd.f32 %v3901_v11, %v4899_v18  ;;  %v3709_v15 = vpop.f32.mrb[28].mxu0  ;;  %v3000_v16 = vpop.f32.mrb[13].mxu1 }
 0x26b   : > { %3077 = vst.msk [vmem:[%s4904_s10 + $0x48] sm:$0xff] %vm486_vm1, %v3061_v12  ;;  %v3902_v17 = vadd.f32 %v3849_v13, %v3709_v15  ;;  %v1874_v19 = vpop.f32.mrb[29].mxu0 }
 0x26c   : > { %3076 = vst.msk [vmem:[%s4904_s10 + $0x40] sm:$0xff] %vm486_vm1, %v3060_v14  ;;  %v3903_v20 = vadd.f32 %v3000_v16, %v1874_v19 }
 0x26d   : > { %v3063_v22 = vadd.f32 %v3902_v17, %v4899_v18  ;;  %v3852_v23 = vpop.f32.mrb[14].mxu1 }
 0x26e   : > { %v3062_v24 = vadd.f32 %v3903_v20, %v4899_v18  ;;  %v3712_v27 = vpop.f32.mrb[30].mxu0  ;;  %v3010_v28 = vpop.f32.mrb[15].mxu1 }
 0x26f   : > { %3079 = vst.msk [vmem:[%s4904_s10 + $0x58] sm:$0xff] %vm486_vm1, %v3063_v22  ;;  %v3904_v29 = vadd.f32 %v3852_v23, %v3712_v27  ;;  %v1884_v30 = vpop.f32.mrb[31].mxu0 }
 0x270   : > { %3078 = vst.msk [vmem:[%s4904_s10 + $0x50] sm:$0xff] %vm486_vm1, %v3062_v24  ;;  %v3905_v35 = vadd.f32 %v3010_v28, %v1884_v30 }
 0x271   : > { %v3065_v34 = vadd.f32 %v3904_v29, %v4899_v18  ;;  %v3855_v36 = vpop.f32.mrb[16].mxu1 }
 0x272   : > { %v3064_v39 = vadd.f32 %v3905_v35, %v4899_v18  ;;  %v3715_v44 = vpop.f32.mrb[32].mxu0  ;;  %v3020_v45 = vpop.f32.mrb[17].mxu1 }
 0x273   : > { %3081 = vst.msk [vmem:[%s4904_s10 + $0x68] sm:$0xff] %vm486_vm1, %v3065_v34  ;;  %v3906_v43 = vadd.f32 %v3855_v36, %v3715_v44  ;;  %v1894_v46 = vpop.f32.mrb[33].mxu0 }
 0x274   : > { %3080 = vst.msk [vmem:[%s4904_s10 + $0x60] sm:$0xff] %vm486_vm1, %v3064_v39  ;;  %v3907_v56 = vadd.f32 %v3020_v45, %v1894_v46 }
 0x275   : > { %v3067_v59 = vadd.f32 %v3906_v43, %v4899_v18 }
 0x276   : > { %v3066_v6 = vadd.f32 %v3907_v56, %v4899_v18 }
 0x277   : > { %3083 = vst.msk [vmem:[%s4904_s10 + $0x78] sm:$0xff] %vm486_vm1, %v3067_v59 }
 0x278   : > { %3082 = vst.msk [vmem:[%s4904_s10 + $0x70] sm:$0xff] %vm486_vm1, %v3066_v6 }
 0x279 PF: > { %s19_s13 = sadd.s32 1, %s4099_s13   ;;  %s4983_s30 = smov %s4091_s11 }
 0x27a   : > { %p16_p11 = scmp.ge.s32.totalorder %s19_s13, 6   ;;  %s4984_s10 = smov %s4095_s12 }
 0x27b   : > { %s4985_s11 = smov %s4988_s14  ;;  %s4986_s12 = smov %s4992_s15 }
 0x27c   :  { %18 = sbr.rel (!%p16_p11) target bundleno = 3 (0x3), region = 92 }

</bundles_post_ra>
